<compile_context>
chip_gen: v5e
topology: v5e:2x2
jax: 0.10.0
libtpu: 0.0.40
codegen_flags: <defaults>
</compile_context>

<pallas_src>
import jax
import jax.numpy as jnp
from jax.experimental import pallas as pl
from jax.experimental.pallas import tpu as pltpu

_BF16 = jnp.bfloat16
_F32 = jnp.float32


def _round_up(x, m):
    return (x + m - 1) // m * m


def _vmem_limit_bytes(default=32 * 1024 * 1024):
    """Generation-aware scoped VMEM limit (128 MiB phys on v5e/v6e, 64 MiB on v7x)."""
    try:
        cap = int(pltpu.get_tpu_info().vmem_capacity_bytes)
        return int(min(max(cap * 3 // 4, default), 100 * 1024 * 1024))
    except Exception:
        return default


def _choose_tiles(n_pad_hint):
    """Row tile tm / reduction tile tk for streaming the N x N matrices.
    tm=128 keeps >= 2 row blocks even at small N so the 'parallel' row axis can
    shard across both TensorCores on v7x."""
    tm = 128
    if n_pad_hint >= 4096:
        tk = 1024
    elif n_pad_hint >= 1024:
        tk = 512
    elif n_pad_hint >= 512:
        tk = 256
    else:
        tk = 128
    return tm, tk


def _masked_log_softmax(y, valid_cols):
    col = jax.lax.broadcasted_iota(jnp.int32, y.shape, 1)
    valid = col < valid_cols
    zm = jnp.where(valid, y, jnp.float32(-1e30))
    m = jnp.max(zm, axis=1, keepdims=True)
    z = zm - m
    lse = jnp.log(jnp.sum(jnp.where(valid, jnp.exp(z), 0.0),
                          axis=1, keepdims=True))
    return z - lse


# ----------------------------------------------------------------------------
# Streamed-matmul path (large graphs): out = epilogue(A @ B), A streamed tiles.
# ----------------------------------------------------------------------------
def _make_streamed_kernel(*, tk, epilogue, valid_cols):
    assert epilogue in ("scale", "relu_matmul", "log_softmax")

    def kernel(*refs):
        if epilogue == "scale":
            a_ref, b_ref, d_ref, o_ref, acc_ref = refs
        elif epilogue == "relu_matmul":
            a_ref, b_ref, w_ref, o_ref, acc_ref = refs
        else:
            a_ref, b_ref, o_ref, acc_ref = refs

        k = pl.program_id(1)

        @pl.when(k == 0)
        def _init():
            acc_ref[...] = jnp.zeros_like(acc_ref)

        # Slice the VMEM-resident narrow operand at the current reduction step.
        start = pl.multiple_of(k * tk, tk)
        acc_ref[...] += jnp.dot(a_ref[...], b_ref[pl.ds(start, tk), :],
                                preferred_element_type=jnp.float32)

        @pl.when(k == pl.num_programs(1) - 1)
        def _finalize():
            acc = acc_ref[...]
            if epilogue == "scale":
                # diag(d_l) folded here: diag(d) @ (Pinv @ T) == d * (Pinv @ T)
                o_ref[...] = (d_ref[...] * acc).astype(o_ref.dtype)
            elif epilogue == "relu_matmul":
                h = jnp.maximum(acc, 0.0).astype(w_ref.dtype)
                o_ref[...] = jnp.dot(
                    h, w_ref[...],
                    preferred_element_type=jnp.float32).astype(o_ref.dtype)
            else:  # masked log-softmax over the real (unpadded) class columns
                o_ref[...] = _masked_log_softmax(acc, valid_cols
                                                 ).astype(o_ref.dtype)

    return kernel


def _streamed_matmul(a, b, *, d=None, w=None, epilogue, valid_cols=0,
                     out_dtype=_BF16, tm, tk, vmem_limit):
    n = a.shape[0]
    wp = b.shape[1]
    op = w.shape[1] if w is not None else wp

    kernel = _make_streamed_kernel(tk=tk, epilogue=epilogue,
                                   valid_cols=valid_cols)

    # Whole-array VMEM residency (no blocking) => single-buffered, copied once.
    resident = pl.BlockSpec(memory_space=pltpu.MemorySpace.VMEM)

    in_specs = [pl.BlockSpec((tm, tk), lambda i, k: (i, k)),  # streamed N x N
                resident]                                      # narrow operand
    operands = [a, b]
    if epilogue == "scale":
        in_specs.append(pl.BlockSpec((tm, 1), lambda i, k: (i, 0)))
        operands.append(d)
    elif epilogue == "relu_matmul":
        in_specs.append(resident)
        operands.append(w)

    out_itemsize = jnp.dtype(out_dtype).itemsize
    flops = 2 * n * n * wp + (2 * n * wp * op if epilogue == "relu_matmul" else 0)
    transcendentals = n * (op + 1) if epilogue == "log_softmax" else 0
    bytes_accessed = (a.size * a.dtype.itemsize + b.size * b.dtype.itemsize
                      + (w.size * w.dtype.itemsize if w is not None else 0)
                      + (d.size * d.dtype.itemsize if d is not None else 0)
                      + n * op * out_itemsize)

    return pl.pallas_call(
        kernel,
        out_shape=jax.ShapeDtypeStruct((n, op), out_dtype),
        grid=(n // tm, n // tk),
        in_specs=in_specs,
        out_specs=pl.BlockSpec((tm, op), lambda i, k: (i, 0)),
        scratch_shapes=[pltpu.VMEM((tm, wp), jnp.float32)],
        compiler_params=pltpu.CompilerParams(
            dimension_semantics=("parallel", "arbitrary"),
            vmem_limit_bytes=vmem_limit),
        cost_estimate=pl.CostEstimate(flops=flops,
                                      transcendentals=transcendentals,
                                      bytes_accessed=bytes_accessed),
    )(*operands)


# ----------------------------------------------------------------------------
# Fully fused path (small graphs): whole forward in one pallas_call.
# ----------------------------------------------------------------------------
def _make_fused_kernel(valid_cols):
    def kernel(x_ref, psi_ref, pinv_ref, w1_ref, d1_ref, w2_ref, d2_ref, o_ref):
        f32, bf16 = jnp.float32, jnp.bfloat16
        t1 = jnp.dot(x_ref[...], w1_ref[...], preferred_element_type=f32)
        u1 = d1_ref[...] * jnp.dot(pinv_ref[...], t1.astype(bf16),
                                   preferred_element_type=f32)
        h = jnp.maximum(jnp.dot(psi_ref[...], u1.astype(bf16),
                                preferred_element_type=f32), 0.0)
        # TODO(synk): training-mode dropout (pltpu.prng_*) not implemented;
        # eval-mode (identity) semantics used, matching F.dropout(training=False).
        t2 = jnp.dot(h.astype(bf16), w2_ref[...], preferred_element_type=f32)
        u2 = d2_ref[...] * jnp.dot(pinv_ref[...], t2.astype(bf16),
                                   preferred_element_type=f32)
        y = jnp.dot(psi_ref[...], u2.astype(bf16), preferred_element_type=f32)
        o_ref[...] = _masked_log_softmax(y, valid_cols).astype(o_ref.dtype)

    return kernel


def _fused_forward(xp, psi, pinv, w1p, d1p, w2p, d2p, *, valid_cols, vmem_limit):
    n_pad = psi.shape[0]
    op = w2p.shape[1]
    resident = pl.BlockSpec(memory_space=pltpu.MemorySpace.VMEM)
    return pl.pallas_call(
        _make_fused_kernel(valid_cols),
        out_shape=jax.ShapeDtypeStruct((n_pad, op), jnp.float32),
        in_specs=[resident] * 7,
        out_specs=resident,
        compiler_params=pltpu.CompilerParams(vmem_limit_bytes=vmem_limit),
    )(xp, psi, pinv, w1p, d1p, w2p, d2p)


# ----------------------------------------------------------------------------
# Model wrapper: one-time prep (pad + bf16 cast) + jitted forward.
# ----------------------------------------------------------------------------
def make_gwnn_forward(wavelets, wavelets_inv, w1, d1, w2, d2,
                      dropout_rate=0.5, *, force_streamed=False):
    del dropout_rate  # eval-mode dropout is the identity.
    n = wavelets.shape[0]
    feature, hidden = w1.shape
    out_dims = w2.shape[1]

    n_pad_hint = _round_up(n, 128)
    use_fused = (not force_streamed) and n_pad_hint <= 1024
    if use_fused:
        tm = tk = None
        n_pad = n_pad_hint
    else:
        tm, tk = _choose_tiles(n_pad_hint)
        n_pad = _round_up(n, tk)

    fp = _round_up(feature, 128)
    hp = _round_up(hidden, 128)
    op = _round_up(out_dims, 128)
    pad_n = n_pad - n

    # One-time pad + bf16 quantization of the big N x N matrices (cached across
    # forward calls).  Only ONE copy of Psi_inv is kept: diag(d_l) is applied
    # as a per-row scale inside the kernels, not folded into the matrix.
    psi = jnp.pad(jnp.asarray(wavelets, _F32),
                  ((0, pad_n), (0, pad_n))).astype(_BF16)
    pinv = jnp.pad(jnp.asarray(wavelets_inv, _F32),
                   ((0, pad_n), (0, pad_n))).astype(_BF16)
    d1p = jnp.pad(jnp.asarray(d1, _F32).reshape(n, 1), ((0, pad_n), (0, 0)))
    d2p = jnp.pad(jnp.asarray(d2, _F32).reshape(n, 1), ((0, pad_n), (0, 0)))
    w1p = jnp.pad(jnp.asarray(w1, _F32),
                  ((0, fp - feature), (0, hp - hidden))).astype(_BF16)
    w2p = jnp.pad(jnp.asarray(w2, _F32),
                  ((0, hp - hidden), (0, op - out_dims))).astype(_BF16)

    vmem_limit = _vmem_limit_bytes()

    @jax.jit
    def forward(x):
        xp = jnp.pad(jnp.asarray(x, _F32),
                     ((0, pad_n), (0, fp - feature))).astype(_BF16)
        if use_fused:
            logp = _fused_forward(xp, psi, pinv, w1p, d1p, w2p, d2p,
                                  valid_cols=out_dims, vmem_limit=vmem_limit)
        else:
            # Layer 1: Psi @ (d1 * (Psi^-1 @ (X @ W1))); relu + @W2 fused below.
            t1 = jnp.dot(xp, w1p, preferred_element_type=_F32).astype(_BF16)
            u1 = _streamed_matmul(pinv, t1, d=d1p, epilogue="scale",
                                  tm=tm, tk=tk, vmem_limit=vmem_limit)
            t2 = _streamed_matmul(psi, u1, w=w2p, epilogue="relu_matmul",
                                  tm=tm, tk=tk, vmem_limit=vmem_limit)
            # TODO(synk): training-mode dropout between layers not implemented.
            # Layer 2: Psi @ (d2 * (Psi^-1 @ t2)), masked log-softmax fused.
            u2 = _streamed_matmul(pinv, t2, d=d2p, epilogue="scale",
                                  tm=tm, tk=tk, vmem_limit=vmem_limit)
            logp = _streamed_matmul(psi, u2, epilogue="log_softmax",
                                    valid_cols=out_dims, out_dtype=_F32,
                                    tm=tm, tk=tk, vmem_limit=vmem_limit)
        return logp[:n, :out_dims]

    return forward


def reference_forward(x, wavelets, wavelets_inv, w1, d1, w2, d2):
    """Pure-JAX reference mirroring the kernel's bf16 operand quantization
    (f32 accumulation), so the check isolates tiling/fusion correctness."""
    bf16, f32 = jnp.bfloat16, jnp.float32
    q = lambda a: a.astype(bf16).astype(f32)
    psi, pinv = q(wavelets), q(wavelets_inv)
    t1 = q(q(x) @ q(w1))
    u1 = q(d1 * (pinv @ t1))
    h = q(jnp.maximum(psi @ u1, 0.0))
    t2 = q(h @ q(w2))
    u2 = q(d2 * (pinv @ t2))
    return jax.nn.log_softmax(psi @ u2, axis=1)


if __name__ == "__main__":
    node_cnt, feature_dims, hidden_dims, output_dims = 256, 16, 32, 8
    dropout_rate = 0.5

    key = jax.random.PRNGKey(0)
    kx, kpsi, kw1, kd1, kw2, kd2 = jax.random.split(key, 6)

    x = jax.random.normal(kx, (node_cnt, feature_dims), dtype=jnp.float32)

    # Synthetic wavelet basis: well-conditioned matrix and its exact inverse.
    base = jnp.eye(node_cnt, dtype=jnp.float32) + 0.05 * jax.random.normal(
        kpsi, (node_cnt, node_cnt), dtype=jnp.float32)
    wavelets = base
    wavelets_inv = jnp.linalg.inv(base).astype(jnp.float32)

    w1 = jax.random.uniform(kw1, (feature_dims, hidden_dims), jnp.float32, -1.0, 1.0)
    d1 = jax.random.uniform(kd1, (node_cnt, 1), jnp.float32, 0.9, 1.1)
    w2 = jax.random.uniform(kw2, (hidden_dims, output_dims), jnp.float32, -1.0, 1.0)
    d2 = jax.random.uniform(kd2, (node_cnt, 1), jnp.float32, 0.9, 1.1)

    ref = reference_forward(x, wavelets, wavelets_inv, w1, d1, w2, d2)

    # Small-graph fully fused single pallas_call path.
    fwd_fused = make_gwnn_forward(wavelets, wavelets_inv, w1, d1, w2, d2,
                                  dropout_rate)
    pred_fused = jax.block_until_ready(fwd_fused(x))

    # Large-graph streamed/tiled path, exercised here at small N for coverage.
    fwd_streamed = make_gwnn_forward(wavelets, wavelets_inv, w1, d1, w2, d2,
                                     dropout_rate, force_streamed=True)
    pred_streamed = jax.block_until_ready(fwd_streamed(x))

    for name, pred in (("fused", pred_fused), ("streamed", pred_streamed)):
        assert pred.shape == (node_cnt, output_dims), (name, pred.shape)
        err = float(jnp.max(jnp.abs(pred - ref)))
        assert jnp.allclose(pred, ref, atol=2.5e-2, rtol=2.5e-2), (
            f"{name}: mismatch vs reference, max abs err = {err}")

    print("KERNEL_OK")
</pallas_src>

<mosaic_0001>
module attributes {stable_mosaic.version = 11 : i64} {
  func.func @kernel(%arg0: memref<256x128xbf16, #tpu.memory_space<vmem>>, %arg1: memref<256x256xbf16, #tpu.memory_space<vmem>>, %arg2: memref<256x256xbf16, #tpu.memory_space<vmem>>, %arg3: memref<128x128xbf16, #tpu.memory_space<vmem>>, %arg4: memref<256x1xf32, #tpu.memory_space<vmem>>, %arg5: memref<128x128xbf16, #tpu.memory_space<vmem>>, %arg6: memref<256x1xf32, #tpu.memory_space<vmem>>, %arg7: memref<256x128xf32, #tpu.memory_space<vmem>>) attributes {dimension_semantics = [], scalar_prefetch = 0 : i64, scratch_operands = 0 : i64, tpu.core_type = #tpu.core_type<tc>} {
    %c0 = arith.constant 0 : index
    %c0_0 = arith.constant 0 : index
    %0 = vector.load %arg0[%c0, %c0_0] : memref<256x128xbf16, #tpu.memory_space<vmem>>, vector<256x128xbf16>
    %c0_1 = arith.constant 0 : index
    %c0_2 = arith.constant 0 : index
    %1 = vector.load %arg3[%c0_1, %c0_2] : memref<128x128xbf16, #tpu.memory_space<vmem>>, vector<128x128xbf16>
    %cst = arith.constant dense<0.000000e+00> : vector<256x128xf32>
    %2 = tpu.matmul %0, %1, %cst {dimension_numbers = #tpu.dot_dimension_numbers<[1], [0], [0], [1], [0, 0, 1, 1], [], []>} : vector<256x128xbf16>, vector<128x128xbf16>, vector<256x128xf32> -> vector<256x128xf32>
    %c0_3 = arith.constant 0 : index
    %c0_4 = arith.constant 0 : index
    %3 = vector.load %arg4[%c0_3, %c0_4] : memref<256x1xf32, #tpu.memory_space<vmem>>, vector<256x1xf32>
    %c0_5 = arith.constant 0 : index
    %c0_6 = arith.constant 0 : index
    %4 = vector.load %arg2[%c0_5, %c0_6] : memref<256x256xbf16, #tpu.memory_space<vmem>>, vector<256x256xbf16>
    %5 = arith.truncf %2 : vector<256x128xf32> to vector<256x128xbf16>
    %cst_7 = arith.constant dense<0.000000e+00> : vector<256x128xf32>
    %6 = tpu.matmul %4, %5, %cst_7 {dimension_numbers = #tpu.dot_dimension_numbers<[1], [0], [0], [1], [0, 0, 1, 1], [], []>} : vector<256x256xbf16>, vector<256x128xbf16>, vector<256x128xf32> -> vector<256x128xf32>
    %7 = vector.broadcast %3 : vector<256x1xf32> to vector<256x128xf32>
    %8 = arith.mulf %7, %6 : vector<256x128xf32>
    %c0_8 = arith.constant 0 : index
    %c0_9 = arith.constant 0 : index
    %9 = vector.load %arg1[%c0_8, %c0_9] : memref<256x256xbf16, #tpu.memory_space<vmem>>, vector<256x256xbf16>
    %10 = arith.truncf %8 : vector<256x128xf32> to vector<256x128xbf16>
    %cst_10 = arith.constant dense<0.000000e+00> : vector<256x128xf32>
    %11 = tpu.matmul %9, %10, %cst_10 {dimension_numbers = #tpu.dot_dimension_numbers<[1], [0], [0], [1], [0, 0, 1, 1], [], []>} : vector<256x256xbf16>, vector<256x128xbf16>, vector<256x128xf32> -> vector<256x128xf32>
    %cst_11 = arith.constant 0.000000e+00 : f32
    %12 = vector.broadcast %cst_11 : f32 to vector<256x128xf32>
    %13 = arith.maximumf %11, %12 : vector<256x128xf32>
    %14 = arith.truncf %13 : vector<256x128xf32> to vector<256x128xbf16>
    %c0_12 = arith.constant 0 : index
    %c0_13 = arith.constant 0 : index
    %15 = vector.load %arg5[%c0_12, %c0_13] : memref<128x128xbf16, #tpu.memory_space<vmem>>, vector<128x128xbf16>
    %cst_14 = arith.constant dense<0.000000e+00> : vector<256x128xf32>
    %16 = tpu.matmul %14, %15, %cst_14 {dimension_numbers = #tpu.dot_dimension_numbers<[1], [0], [0], [1], [0, 0, 1, 1], [], []>} : vector<256x128xbf16>, vector<128x128xbf16>, vector<256x128xf32> -> vector<256x128xf32>
    %c0_15 = arith.constant 0 : index
    %c0_16 = arith.constant 0 : index
    %17 = vector.load %arg6[%c0_15, %c0_16] : memref<256x1xf32, #tpu.memory_space<vmem>>, vector<256x1xf32>
    %c0_17 = arith.constant 0 : index
    %c0_18 = arith.constant 0 : index
    %18 = vector.load %arg2[%c0_17, %c0_18] : memref<256x256xbf16, #tpu.memory_space<vmem>>, vector<256x256xbf16>
    %19 = arith.truncf %16 : vector<256x128xf32> to vector<256x128xbf16>
    %cst_19 = arith.constant dense<0.000000e+00> : vector<256x128xf32>
    %20 = tpu.matmul %18, %19, %cst_19 {dimension_numbers = #tpu.dot_dimension_numbers<[1], [0], [0], [1], [0, 0, 1, 1], [], []>} : vector<256x256xbf16>, vector<256x128xbf16>, vector<256x128xf32> -> vector<256x128xf32>
    %21 = vector.broadcast %17 : vector<256x1xf32> to vector<256x128xf32>
    %22 = arith.mulf %21, %20 : vector<256x128xf32>
    %c0_20 = arith.constant 0 : index
    %c0_21 = arith.constant 0 : index
    %23 = vector.load %arg1[%c0_20, %c0_21] : memref<256x256xbf16, #tpu.memory_space<vmem>>, vector<256x256xbf16>
    %24 = arith.truncf %22 : vector<256x128xf32> to vector<256x128xbf16>
    %cst_22 = arith.constant dense<0.000000e+00> : vector<256x128xf32>
    %25 = tpu.matmul %23, %24, %cst_22 {dimension_numbers = #tpu.dot_dimension_numbers<[1], [0], [0], [1], [0, 0, 1, 1], [], []>} : vector<256x256xbf16>, vector<256x128xbf16>, vector<256x128xf32> -> vector<256x128xf32>
    %26 = tpu.iota {dimensions = array<i32: 1>} : vector<256x128xi32>
    %c8_i32 = arith.constant 8 : i32
    %27 = vector.broadcast %c8_i32 : i32 to vector<256x128xi32>
    %28 = arith.cmpi slt, %26, %27 : vector<256x128xi32>
    %cst_23 = arith.constant -1.000000e+30 : f32
    %29 = vector.broadcast %cst_23 : f32 to vector<256x128xf32>
    %30 = arith.select %28, %25, %29 : vector<256x128xi1>, vector<256x128xf32>
    %cst_24 = arith.constant dense<0xFF800000> : vector<256xf32>
    %31 = vector.multi_reduction <maximumf>, %30, %cst_24 [1] : vector<256x128xf32> to vector<256xf32>
    %32 = vector.shape_cast %31 : vector<256xf32> to vector<256x1xf32>
    %33 = vector.broadcast %32 : vector<256x1xf32> to vector<256x128xf32>
    %34 = arith.subf %30, %33 : vector<256x128xf32>
    %35 = math.exp %34 : vector<256x128xf32>
    %cst_25 = arith.constant 0.000000e+00 : f32
    %36 = vector.broadcast %cst_25 : f32 to vector<256x128xf32>
    %37 = arith.select %28, %35, %36 : vector<256x128xi1>, vector<256x128xf32>
    %cst_26 = arith.constant dense<0.000000e+00> : vector<256xf32>
    %38 = vector.multi_reduction <add>, %37, %cst_26 [1] : vector<256x128xf32> to vector<256xf32>
    %39 = vector.shape_cast %38 : vector<256xf32> to vector<256x1xf32>
    %40 = math.log %39 : vector<256x1xf32>
    %41 = vector.broadcast %40 : vector<256x1xf32> to vector<256x128xf32>
    %42 = arith.subf %34, %41 : vector<256x128xf32>
    %c0_27 = arith.constant 0 : index
    %c0_28 = arith.constant 0 : index
    %43 = vector.load %arg7[%c0_27, %c0_28] : memref<256x128xf32, #tpu.memory_space<vmem>>, vector<256x128xf32>
    tpu.vector_store %arg7[%c0_27, %c0_28], %42 {strides = array<i32>} : memref<256x128xf32, #tpu.memory_space<vmem>>, vector<256x128xf32>,
    return
  }
}

</mosaic_0001>

<bundles_post_ra>
// kernel: forward.1
= control target key start
LH: loop header
LB: loop body
LE: loop exit
PB: predicated region body
PF: predicated region fallthrough
CT: control target
= control target key end

     0   :  { %12 = vsyncpa [#allocation3], 0  ;;  %s4595_s0 = inlined_call_operand.vmem [shape: bf16[256,128], index: 0, kind: input, shape index: {}]   ;;  %s4596_s1 = inlined_call_operand.hbm [shape: bf16[256,256], index: 1, kind: input, shape index: {}]   ;;  %s4597_s2 = inlined_call_operand.hbm [shape: bf16[256,256], index: 2, kind: input, shape index: {}]   ;;  %s4598_s3 = inlined_call_operand.vmem [shape: bf16[128,128], index: 3, kind: input, shape index: {}]   ;;  %s4599_s4 = inlined_call_operand.hbm [shape: f32[256,1], index: 4, kind: input, shape index: {}]   ;;  %s4600_s5 = inlined_call_operand.vmem [shape: bf16[128,128], index: 5, kind: input, shape index: {}]   ;;  %s4601_s6 = inlined_call_operand.vmem [shape: f32[256,1], index: 6, kind: input, shape index: {}]   ;;  %s4602_s7 = inlined_call_operand.vmem [shape: f32[256,128], index: 7, kind: output, shape index: {}]  }
   0x1   :  { %13 = vsyncpa [#allocation5], 0  ;;  %s33_s26 = sshll.u32 %s4597_s2, 4  ;;  %s3297_s27 = smov [#allocation4]   ;;  %s34_s26 = int_to_ptr.hbm [resolvable:$true] %s33_s26 }
   0x2   :  { %s35_s28 = sshll.u32 %s3297_s27, 4  ;;  %s20_s8 = sshll.u32 %s4596_s1, 4  ;;  %s36_s28 = int_to_ptr.vmem [resolvable:$true] %s35_s28  ;;  %s21_s8 = int_to_ptr.hbm [resolvable:$true] %s20_s8 }
   0x3   :  { %s3298_s9 = smov 128   ;;  %s3299_s10 = smov 8  }
   0x4   :  { %41 = dma.hbm_to_vmem [thread:$0]  %s34_s26, 4096, %s36_s28, [#allocation5], %s3298_s9, %s3298_s9, %s3299_s10  }
   0x5   :  { %s3300_s11 = smov [#allocation2]   ;;  %s48_s15 = sshll.u32 %s4599_s4, 4  ;;  %s49_s15 = int_to_ptr.hbm [resolvable:$true] %s48_s15 }
   0x6   :  { %s22_s12 = sshll.u32 %s3300_s11, 4  ;;  %s3301_s2 = smov [#allocation6]   ;;  %s23_s12 = int_to_ptr.vmem [resolvable:$true] %s22_s12 }
   0x7   :  { %28 = dma.hbm_to_vmem [thread:$0]  %s21_s8, 4096, %s23_s12, [#allocation3], %s3298_s9, %s3298_s9, %s3299_s10  }
   0x8   :  { %s50_s16 = sshll.u32 %s3301_s2, 4  ;;  %s51_s16 = int_to_ptr.vmem [resolvable:$true] %s50_s16 }
   0x9   :  { %56 = dma.hbm_to_vmem [thread:$0]  %s49_s15, 4096, %s51_s16, [#allocation5], %s3298_s9, %s3298_s9, %s3299_s10  }
   0xa   :  { %3293 = dma.done.wait [#allocation3], 4096  }
   0xb   :  { %3294 = vsyncadd [#allocation3], 4294963200 }
   0xc   :  { %3295 = dma.done.wait [#allocation5], 8192  }
   0xd   :  { %3296 = vsyncadd [#allocation5], 4294959104  ;;  %v2995_v0 = vld [vmem:[%s4598_s3 + $0x38] sm:$0xff]  ;;  %v2994_v1 = vld [vmem:[%s4598_s3 + $0x30] sm:$0xff]  ;;  %v3302_v46 = vmov 0  }
   0xe   :  { %265 = vmatpush.bf16.msra.mxu0 %v2995_v0  ;;  %3068 = vmatpush.bf16.msra.mxu2 %v2995_v0  ;;  %v2993_v2 = vld [vmem:[%s4598_s3 + $0x28] sm:$0xff]  ;;  %v2992_v3 = vld [vmem:[%s4598_s3 + $0x20] sm:$0xff]  ;;  %v2991_v4 = vld [vmem:[%s4598_s3 + $0x18] sm:$0xff] }
   0xf   :  { %v2990_v5 = vld [vmem:[%s4598_s3 + $0x10] sm:$0xff]  ;;  %v2989_v6 = vld [vmem:[%s4598_s3 + $0x8] sm:$0xff]  ;;  %v2988_v7 = vld [vmem:[%s4598_s3] sm:$0xff]  ;;  %3090 = vset.pattern.permute.xlu0 %v3302_v46  ;;  %3092 = vset.pattern.permute.xlu2 %v3302_v46 }
  0x10   :  { %v2972_v8 = vld [vmem:[%s4595_s0] sm:$0xff]  ;;  %v2973_v10 = vld [vmem:[%s4595_s0 + $0x8] sm:$0xff]  ;;  %v2974_v12 = vld [vmem:[%s4595_s0 + $0x10] sm:$0xff]  ;;  %3091 = vset.pattern.permute.xlu1 %v3302_v46 }
  0x11   :  { %v2980_v9 = vld [vmem:[%s4595_s0 + $0x40] sm:$0xff]  ;;  %v2981_v11 = vld [vmem:[%s4595_s0 + $0x48] sm:$0xff]  ;;  %v2982_v13 = vld [vmem:[%s4595_s0 + $0x50] sm:$0xff] }
  0x12   :  { %266 = vmatpush.bf16.msra.mxu0 %v2994_v1  ;;  %3069 = vmatpush.bf16.msra.mxu2 %v2994_v1  ;;  %v2975_v14 = vld [vmem:[%s4595_s0 + $0x18] sm:$0xff]  ;;  %v2976_v16 = vld [vmem:[%s4595_s0 + $0x20] sm:$0xff]  ;;  %v2977_v18 = vld [vmem:[%s4595_s0 + $0x28] sm:$0xff] }
  0x13   :  { %v2983_v15 = vld [vmem:[%s4595_s0 + $0x58] sm:$0xff]  ;;  %v2984_v17 = vld [vmem:[%s4595_s0 + $0x60] sm:$0xff]  ;;  %v2985_v19 = vld [vmem:[%s4595_s0 + $0x68] sm:$0xff] }
  0x14   :  { %v2978_v20 = vld [vmem:[%s4595_s0 + $0x30] sm:$0xff]  ;;  %v2979_v22 = vld [vmem:[%s4595_s0 + $0x38] sm:$0xff]  ;;  %v366_v56 = vld [vmem:[#allocation6 + $0x60] sm:$0xff] }
  0x15   :  { %v2986_v21 = vld [vmem:[%s4595_s0 + $0x70] sm:$0xff]  ;;  %v2987_v23 = vld [vmem:[%s4595_s0 + $0x78] sm:$0xff]  ;;  %v383_v57 = vld [vmem:[#allocation6 + $0xe8] sm:$0xff]  ;;  %834 = vperm.xlu1 %3091, %v366_v56  }
  0x16   :  { %267 = vmatpush.bf16.msra.mxu0 %v2993_v2  ;;  %3070 = vmatpush.bf16.msra.mxu2 %v2993_v2  ;;  %v368_v45 = vld [vmem:[#allocation6 + $0x70] sm:$0xff]  ;;  %v369_v49 = vld [vmem:[#allocation6 + $0x78] sm:$0xff]  ;;  %v367_v61 = vld [vmem:[#allocation6 + $0x68] sm:$0xff] }
  0x17   :  { %844 = vperm.xlu0 %3090, %v368_v45   ;;  %v364_v52 = vld [vmem:[#allocation6 + $0x50] sm:$0xff]  ;;  %v385_v60 = vld [vmem:[#allocation6 + $0xf8] sm:$0xff]  ;;  %v382_v2 = vld [vmem:[#allocation6 + $0xe0] sm:$0xff] }
  0x18   :  { %v384_v55 = vld [vmem:[#allocation6 + $0xf0] sm:$0xff]  ;;  %v354_v46 = vld [vmem:[#allocation6] sm:$0xff] }
  0x19   :  { %924 = vperm.xlu2 %3092, %v384_v55   ;;  %v380_v62 = vld [vmem:[#allocation6 + $0xd0] sm:$0xff]  ;;  %v3003_v55 = vld [vmem:[#allocation4 + $0x34] sm:$0xf0] }
  0x1a   :  { %268 = vmatpush.bf16.msra.mxu0 %v2992_v3  ;;  %3071 = vmatpush.bf16.msra.mxu2 %v2992_v3  ;;  %v365_v3 = vld [vmem:[#allocation6 + $0x58] sm:$0xff] }
  0x1d   :  { %839 = vperm.xlu1 %3091, %v367_v61   ;;  %v2718_v61 = vld [vmem:[#allocation4 + $0x40] sm:$0xf] }
  0x1e   :  { %269 = vmatpush.bf16.msra.mxu0 %v2991_v4  ;;  %3072 = vmatpush.bf16.msra.mxu2 %v2991_v4  ;;  %v361_v4 = vld [vmem:[#allocation6 + $0x38] sm:$0xff] }
  0x1f   :  { %849 = vperm.xlu0 %3090, %v369_v49   ;;  %v3001_v49 = vld [vmem:[#allocation4 + $0x24] sm:$0xf0] }
  0x21   :  { %929 = vperm.xlu2 %3092, %v385_v60  }
  0x22   :  { %270 = vmatpush.bf16.msra.mxu0 %v2990_v5  ;;  %3073 = vmatpush.bf16.msra.mxu2 %v2990_v5 }
  0x25   :  { %829 = vperm.xlu1 %3091, %v365_v3  }
  0x26   :  { %271 = vmatpush.bf16.msra.mxu0 %v2989_v6  ;;  %3074 = vmatpush.bf16.msra.mxu2 %v2989_v6 }
  0x27   :  { %824 = vperm.xlu0 %3090, %v364_v52   ;;  %v2704_v52 = vld [vmem:[#allocation4 + $0x28] sm:$0xf0] }
  0x29   :  { %914 = vperm.xlu2 %3092, %v382_v2  }
  0x2a   :  { %272 = vmatpush.bf16.msra.mxu0 %v2988_v7  ;;  %3075 = vmatpush.bf16.msra.mxu2 %v2988_v7 }
  0x2d   :  { %273 = vmatmul.bf16.vlgmr.msra.gmra.mxu0 %v2972_v8  ;;  %313 = vmatmul.bf16.vlgmr.msra.gmra.mxu2 %v2980_v9  ;;  %v363_v9 = vld [vmem:[#allocation6 + $0x48] sm:$0xff] }
  0x2f   :  { %919 = vperm.xlu0 %3090, %v383_v57   ;;  %v3002_v57 = vld [vmem:[#allocation4 + $0x34] sm:$0xf] }
  0x31   :  { %819 = vperm.xlu2 %3092, %v363_v9  }
  0x37   :  { %904 = vperm.xlu0 %3090, %v380_v62   ;;  %v3005_v62 = vld [vmem:[#allocation4 + $0x44] sm:$0xf0] }
  0x3d   :  { %278 = vmatmul.bf16.gmra.mxu0 %v2973_v10  ;;  %318 = vmatmul.bf16.gmra.mxu2 %v2981_v11  ;;  %v362_v10 = vld [vmem:[#allocation6 + $0x40] sm:$0xff] }
  0x3e   :  { %v358_v11 = vld [vmem:[#allocation6 + $0x20] sm:$0xff]  ;;  %814 = vperm.xlu1 %3091, %v362_v10   ;;  %v3006_v10 = vld [vmem:[#allocation4 + $0x54] sm:$0xf] }
  0x3f   :  { %809 = vperm.xlu0 %3090, %v361_v4  }
  0x47   :  { %794 = vperm.xlu0 %3090, %v358_v11   ;;  %v2728_v11 = vld [vmem:[#allocation4 + $0x58] sm:$0xf0] }
  0x4d   :  { %283 = vmatmul.bf16.gmra.mxu0 %v2974_v12  ;;  %323 = vmatmul.bf16.gmra.mxu2 %v2982_v13 }
  0x5d   :  { %288 = vmatmul.bf16.gmra.mxu0 %v2975_v14  ;;  %328 = vmatmul.bf16.gmra.mxu2 %v2983_v15 }
  0x6d   :  { %293 = vmatmul.bf16.gmra.mxu0 %v2976_v16  ;;  %333 = vmatmul.bf16.gmra.mxu2 %v2984_v17  ;;  %v381_v16 = vld [vmem:[#allocation6 + $0xd8] sm:$0xff]  ;;  %v360_v17 = vld [vmem:[#allocation6 + $0x30] sm:$0xff] }
  0x6e   :  { %909 = vperm.xlu1 %3091, %v381_v16   ;;  %804 = vperm.xlu2 %3092, %v360_v17   ;;  %v2750_v16 = vld [vmem:[#allocation4 + $0x80] sm:$0xf]  ;;  %v3013_v17 = vld [vmem:[#allocation4 + $0x84] sm:$0xf0] }
  0x73   :  { %v3506_v2 = vpop.permute.xlu2 %924 }
  0x7d   :  { %298 = vmatmul.bf16.gmra.mxu0 %v2977_v18  ;;  %338 = vmatmul.bf16.gmra.mxu2 %v2985_v19  ;;  %v377_v18 = vld [vmem:[#allocation6 + $0xb8] sm:$0xff] }
  0x7e   :  { %889 = vperm.xlu0 %3090, %v377_v18   ;;  %v3528_v18 = vor.u32 %v3013_v17, %v2750_v16  ;;  %v1561_v17 = vld [vmem:[%s4601_s6 + $0x50] sm:$0xff] }
  0x80   :  { %4660 = vst [vmem:[#allocation15_spill] sm:$0xff] %v3528_v18 }
  0x89   :  { %v3502_v60 = vpop.permute.xlu0 %844 }
  0x8d   :  { %303 = vmatmul.bf16.gmra.mxu0 %v2978_v20  ;;  %343 = vmatmul.bf16.gmra.mxu2 %v2986_v21 }
  0x91   :  { %v3509_v3 = vpop.permute.xlu0 %849 }
  0x9d   :  { %308 = vmatmul.bf16.gmra.mxu0 %v2979_v22  ;;  %348 = vmatmul.bf16.gmra.mxu2 %v2987_v23  ;;  %v378_v23 = vld [vmem:[#allocation6 + $0xc0] sm:$0xff] }
  0x9e   :  { %894 = vperm.xlu1 %3091, %v378_v23  }
  0xaa   :  { %v3424_v24 = vpop.f32.mrf.mxu0 }
  0xb0   :  { %v3426_v25 = vpop.f32.mrf.mxu2 }
  0xb2   :  { %v3428_v26 = vpop.f32.mrf.mxu0 }
  0xb8   :  { %v3430_v27 = vpop.f32.mrf.mxu2 }
  0xba   :  { %v3432_v28 = vpop.f32.mrf.mxu0 }
  0xc0   :  { %v3434_v29 = vpop.f32.mrf.mxu2 }
  0xc2   :  { %v3436_v30 = vpop.f32.mrf.mxu0 }
  0xc3   :  { %v419_v22 = vpack.c.bf16 %v3436_v30, %v3432_v28  ;;  %v376_v30 = vld [vmem:[#allocation6 + $0xb0] sm:$0xff] }
  0xc8   :  { %v3438_v31 = vpop.f32.mrf.mxu2 }
  0xc9   :  { %v427_v28 = vpack.c.bf16 %v3438_v31, %v3434_v29  ;;  %v356_v29 = vld [vmem:[#allocation6 + $0x10] sm:$0xff] }
  0xca   :  { %v3440_v32 = vpop.f32.mrf.mxu0  ;;  %v2694_v31 = vld [vmem:[#allocation4 + $0x10] sm:$0xf] }
  0xd0   :  { %v3442_v33 = vpop.f32.mrf.mxu2 }
  0xd2   :  { %v3444_v34 = vpop.f32.mrf.mxu0 }
  0xd3   :  { %v420_v20 = vpack.c.bf16 %v3444_v34, %v3440_v32  ;;  %v2686_v34 = vld [vmem:[#allocation4] sm:$0xf] }
  0xd8   :  { %v3446_v35 = vpop.f32.mrf.mxu2 }
  0xd9   :  { %v428_v32 = vpack.c.bf16 %v3446_v35, %v3442_v33  ;;  %v355_v33 = vld [vmem:[#allocation6 + $0x8] sm:$0xff]  ;;  %v426_v35 = vpack.c.bf16 %v3430_v27, %v3426_v25  ;;  %v2702_v27 = vld [vmem:[#allocation4 + $0x20] sm:$0xf] }
  0xda   :  { %v3448_v36 = vpop.f32.mrf.mxu0 }
  0xe0   :  { %v3450_v37 = vpop.f32.mrf.mxu2 }
  0xe2   :  { %v3452_v38 = vpop.f32.mrf.mxu0 }
  0xe3   :  { %v421_v15 = vpack.c.bf16 %v3452_v38, %v3448_v36  ;;  %v379_v36 = vld [vmem:[#allocation6 + $0xc8] sm:$0xff]  ;;  %v374_v38 = vld [vmem:[#allocation6 + $0xa0] sm:$0xff] }
  0xe4   :  { %899 = vperm.xlu2 %3092, %v379_v36   ;;  %874 = vperm.xlu0 %3090, %v374_v38   ;;  %v372_v36 = vld [vmem:[#allocation6 + $0x90] sm:$0xff] }
  0xe8   :  { %v3454_v39 = vpop.f32.mrf.mxu2 }
  0xe9   :  { %v429_v21 = vpack.c.bf16 %v3454_v39, %v3450_v37  ;;  %v418_v37 = vpack.c.bf16 %v3428_v26, %v3424_v24  ;;  %v357_v26 = vld [vmem:[#allocation6 + $0x18] sm:$0xff] }
  0xea   :  { %v294_v40 = vpop.f32.mrf.mxu0 }
  0xec   :  { %884 = vperm.xlu2 %3092, %v376_v30   ;;  %779 = vperm.xlu0 %3090, %v355_v33   ;;  %v2758_v33 = vld [vmem:[#allocation4 + $0x90] sm:$0xf] }
  0xf0   :  { %v3456_v41 = vpop.f32.mrf.mxu2 }
  0xf2   :  { %v296_v42 = vpop.f32.mrf.mxu0 }
  0xf3   :  { %v422_v13 = vpack.c.bf16 %v296_v42, %v294_v40  ;;  %v2997_v40 = vld [vmem:[#allocation4 + $0x4] sm:$0xf0]  ;;  %v2996_v42 = vld [vmem:[#allocation4 + $0x4] sm:$0xf] }
  0xf4   :  { %v3474_v39 = vor.u32 %v2997_v40, %v2686_v34  ;;  %789 = vperm.xlu2 %3092, %v357_v26   ;;  %v2736_v34 = vld [vmem:[#allocation4 + $0x68] sm:$0xf0] }
  0xf8   :  { %v3458_v43 = vpop.f32.mrf.mxu2 }
  0xf9   :  { %v430_v19 = vpack.c.bf16 %v3458_v43, %v3456_v41  ;;  %v359_v41 = vld [vmem:[#allocation6 + $0x28] sm:$0xff] }
  0xfa   :  { %v299_v44 = vpop.f32.mrf.mxu0  ;;  %v2688_v43 = vld [vmem:[#allocation4 + $0x8] sm:$0xf0]  ;;  %799 = vperm.xlu1 %3091, %v359_v41  }
  0xfb   :  { %v3481_v24 = vor.u32 %v2996_v42, %v2688_v43  ;;  %v2742_v42 = vld [vmem:[#allocation4 + $0x70] sm:$0xf]  ;;  %v3011_v43 = vld [vmem:[#allocation4 + $0x74] sm:$0xf0] }
  0xfc   :  { %774 = vperm.xlu2 %3092, %v354_v46   ;;  %v3549_v26 = vor.u32 %v3011_v43, %v2742_v42 }
  0xfd   :  { %4654 = vst [vmem:[#allocation9_spill] sm:$0xff] %v3481_v24 }
  0xfe   :  { %4663 = vst [vmem:[#allocation18_spill] sm:$0xff] %v3549_v26 }
 0x100   :  { %v339_v47 = vpop.f32.mrf.mxu2 }
 0x102   :  { %v301_v48 = vpop.f32.mrf.mxu0  ;;  %784 = vperm.xlu1 %3091, %v356_v29   ;;  %v371_v29 = vld [vmem:[#allocation6 + $0x88] sm:$0xff] }
 0x103   :  { %v423_v8 = vpack.c.bf16 %v301_v48, %v299_v44  ;;  %v2999_v44 = vld [vmem:[#allocation4 + $0x14] sm:$0xf0]  ;;  %v2696_v48 = vld [vmem:[#allocation4 + $0x18] sm:$0xf0] }
 0x104   :  { %v3484_v45 = vor.u32 %v2999_v44, %v2694_v31  ;;  %v1566_v31 = vld [vmem:[%s4601_s6 + $0x78] sm:$0xff] }
 0x108   :  { %v341_v50 = vpop.f32.mrf.mxu2 }
 0x109   :  { %v431_v14 = vpack.c.bf16 %v341_v50, %v339_v47  ;;  %v2998_v47 = vld [vmem:[#allocation4 + $0x14] sm:$0xf]  ;;  %v3490_v50 = vor.u32 %v3001_v49, %v2702_v27 }
 0x10a   :  { %v304_v51 = vpop.f32.mrf.mxu0  ;;  %v3487_v25 = vor.u32 %v2998_v47, %v2696_v48  ;;  %v3010_v47 = vld [vmem:[#allocation4 + $0x74] sm:$0xf]  ;;  %v2744_v48 = vld [vmem:[#allocation4 + $0x78] sm:$0xf0] }
 0x10b   :  { %v3562_v49 = vor.u32 %v3010_v47, %v2744_v48  ;;  %v1582_v48 = vld [vmem:[%s4601_s6 + $0xf8] sm:$0xff] }
 0x10c   :  { %4655 = vst [vmem:[#allocation10_spill] sm:$0xff] %v3487_v25 }
 0x10d   :  { %4665 = vst [vmem:[#allocation20_spill] sm:$0xff] %v3562_v49 }
 0x110   :  { %v344_v53 = vpop.f32.mrf.mxu2 }
 0x112   :  { %v306_v54 = vpop.f32.mrf.mxu0 }
 0x113   :  { %v424_v5 = vpack.c.bf16 %v306_v54, %v304_v51  ;;  %v3000_v51 = vld [vmem:[#allocation4 + $0x24] sm:$0xf]  ;;  %v2710_v54 = vld [vmem:[#allocation4 + $0x30] sm:$0xf] }
 0x114   :  { %v3496_v56 = vor.u32 %v3003_v55, %v2710_v54  ;;  %v1563_v54 = vld [vmem:[%s4601_s6 + $0x60] sm:$0xff] }
 0x118   :  { %v346_v58 = vpop.f32.mrf.mxu2 }
 0x119   :  { %v432_v12 = vpack.c.bf16 %v346_v58, %v344_v53  ;;  %v3493_v53 = vor.u32 %v3000_v51, %v2704_v52  ;;  %v2712_v58 = vld [vmem:[#allocation4 + $0x38] sm:$0xf0]  ;;  %v1581_v52 = vld [vmem:[%s4601_s6 + $0xf0] sm:$0xff] }
 0x11a   :  { %v309_v59 = vpop.f32.mrf.mxu0 }
 0x11b   :  { %4656 = vst [vmem:[#allocation11_spill] sm:$0xff] %v3493_v53 }
 0x120   :  { %v349_v63 = vpop.f32.mrf.mxu2 }
 0x122   :  { %v311_v0 = vpop.f32.mrf.mxu0 }
 0x123   :  { %v425_v1 = vpack.c.bf16 %v311_v0, %v309_v59  ;;  %v3499_v59 = vor.u32 %v3002_v57, %v2712_v58  ;;  %v3004_v0 = vld [vmem:[#allocation4 + $0x44] sm:$0xf]  ;;  %v2766_v57 = vld [vmem:[#allocation4 + $0xa0] sm:$0xf]  ;;  %v3017_v58 = vld [vmem:[#allocation4 + $0xa4] sm:$0xf0] }
 0x125   :  { %594 = vmatpush.bf16.msra.mxu1 %v425_v1  ;;  %3076 = vmatpush.bf16.msra.mxu3 %v425_v1  ;;  %4657 = vst [vmem:[#allocation12_spill] sm:$0xff] %v3499_v59  ;;  %v2720_v1 = vld [vmem:[#allocation4 + $0x48] sm:$0xf0] }
 0x126   :  { %v3511_v4 = vor.u32 %v3004_v0, %v2720_v1  ;;  %v1580_v0 = vld [vmem:[%s4601_s6 + $0xe8] sm:$0xff]  ;;  %v3583_v1 = vor.u32 %v3017_v58, %v2766_v57  ;;  %v3014_v57 = vld [vmem:[#allocation4 + $0x94] sm:$0xf]  ;;  %v2760_v58 = vld [vmem:[#allocation4 + $0x98] sm:$0xf0] }
 0x128   :  { %v351_v6 = vpop.f32.mrf.mxu2  ;;  %4658 = vst [vmem:[#allocation13_spill] sm:$0xff] %v3511_v4 }
 0x129   :  { %595 = vmatpush.bf16.msra.mxu1 %v424_v5  ;;  %3077 = vmatpush.bf16.msra.mxu3 %v424_v5  ;;  %v433_v7 = vpack.c.bf16 %v351_v6, %v349_v63  ;;  %v3504_v63 = vor.u32 %v3005_v62, %v2718_v61  ;;  %v2726_v5 = vld [vmem:[#allocation4 + $0x50] sm:$0xf]  ;;  %v3007_v6 = vld [vmem:[#allocation4 + $0x54] sm:$0xf0]  ;;  %v1564_v62 = vld [vmem:[%s4601_s6 + $0x68] sm:$0xff]  ;;  %4666 = vst [vmem:[#allocation21_spill] sm:$0xff] %v3583_v1 }
 0x12a   :  { %v3518_v9 = vor.u32 %v3007_v6, %v2726_v5  ;;  %v373_v5 = vld [vmem:[#allocation6 + $0x98] sm:$0xff] }
 0x12b   :  { %683 = vmatpush.bf16.msrb.mxu2 %v433_v7  ;;  %v3514_v7 = vpop.permute.xlu2 %929  ;;  %869 = vperm.xlu2 %3092, %v373_v5  }
 0x12d   :  { %596 = vmatpush.bf16.msra.mxu1 %v423_v8  ;;  %3078 = vmatpush.bf16.msra.mxu3 %v423_v8  ;;  %v3516_v8 = vpop.permute.xlu0 %824 }
 0x12f   :  { %684 = vmatpush.bf16.msrb.mxu2 %v432_v12  ;;  %v3521_v12 = vor.u32 %v3006_v10, %v2728_v11  ;;  %v3012_v11 = vld [vmem:[#allocation4 + $0x84] sm:$0xf] }
 0x131   :  { %597 = vmatpush.bf16.msra.mxu1 %v422_v13  ;;  %3079 = vmatpush.bf16.msra.mxu3 %v422_v13  ;;  %4659 = vst [vmem:[#allocation14_spill] sm:$0xff] %v3521_v12 }
 0x133   :  { %685 = vmatpush.bf16.msrb.mxu2 %v431_v14  ;;  %v3523_v13 = vpop.permute.xlu2 %914 }
 0x135   :  { %598 = vmatpush.bf16.msra.mxu1 %v421_v15  ;;  %3080 = vmatpush.bf16.msra.mxu3 %v421_v15  ;;  %v3525_v14 = vpop.permute.xlu0 %919  ;;  %v375_v15 = vld [vmem:[#allocation6 + $0xa8] sm:$0xff] }
 0x136   :  { %879 = vperm.xlu1 %3091, %v375_v15   ;;  %v2752_v15 = vld [vmem:[#allocation4 + $0x88] sm:$0xf0] }
 0x137   :  { %686 = vmatpush.bf16.msrb.mxu2 %v430_v19  ;;  %v370_v19 = vld [vmem:[#allocation6 + $0x80] sm:$0xff]  ;;  %v3588_v16 = vor.u32 %v3012_v11, %v2752_v15  ;;  %v3618_v11 = vor.u32 %v3014_v57, %v2760_v58  ;;  %v1558_v57 = vld [vmem:[%s4601_s6 + $0x38] sm:$0xff] }
 0x138   :  { %854 = vperm.xlu0 %3090, %v370_v19   ;;  %v1577_v19 = vld [vmem:[%s4601_s6 + $0xd0] sm:$0xff]  ;;  %v1575_v15 = vld [vmem:[%s4601_s6 + $0xc0] sm:$0xff]  ;;  %v1574_v58 = vld [vmem:[%s4601_s6 + $0xb8] sm:$0xff] }
 0x139   :  { %599 = vmatpush.bf16.msra.mxu1 %v420_v20  ;;  %3081 = vmatpush.bf16.msra.mxu3 %v420_v20  ;;  %v2734_v20 = vld [vmem:[#allocation4 + $0x60] sm:$0xf]  ;;  %4667 = vst [vmem:[#allocation22_spill] sm:$0xff] %v3588_v16 }
 0x13a   :  { %4669 = vst [vmem:[#allocation24_spill] sm:$0xff] %v3618_v11 }
 0x13b   :  { %687 = vmatpush.bf16.msrb.mxu2 %v429_v21  ;;  %v3009_v21 = vld [vmem:[#allocation4 + $0x64] sm:$0xf0]  ;;  %v3535_v38 = vpop.permute.xlu2 %819 }
 0x13c   :  { %v3533_v23 = vor.u32 %v3009_v21, %v2734_v20 }
 0x13d   :  { %600 = vmatpush.bf16.msra.mxu1 %v419_v22  ;;  %3082 = vmatpush.bf16.msra.mxu3 %v419_v22  ;;  %v3531_v22 = vpop.permute.xlu1 %834  ;;  %v3537_v40 = vpop.permute.xlu0 %904 }
 0x13e   :  { %4661 = vst [vmem:[#allocation16_spill] sm:$0xff] %v3533_v23  ;;  %864 = vperm.xlu1 %3091, %v372_v36  }
 0x13f   :  { %688 = vmatpush.bf16.msrb.mxu2 %v428_v32  ;;  %v3008_v32 = vld [vmem:[#allocation4 + $0x64] sm:$0xf] }
 0x140   :  { %1854 = vperm.xlu0 %3090, %v1566_v31   ;;  %v1560_v31 = vld [vmem:[%s4601_s6 + $0x48] sm:$0xff] }
 0x141   :  { %601 = vmatpush.bf16.msra.mxu1 %v418_v37  ;;  %3083 = vmatpush.bf16.msra.mxu3 %v418_v37  ;;  %v3540_v37 = vor.u32 %v3008_v32, %v2736_v34  ;;  %v1565_v32 = vld [vmem:[%s4601_s6 + $0x70] sm:$0xff] }
 0x142   :  { %1849 = vperm.xlu2 %3092, %v1565_v32  }
 0x143   :  { %689 = vmatpush.bf16.msrb.mxu2 %v427_v28  ;;  %4662 = vst [vmem:[#allocation17_spill] sm:$0xff] %v3540_v37  ;;  %v3545_v30 = vpop.permute.xlu2 %804 }
 0x144   :  { %602 = vmatmul.bf16.vlgmr.msra.gmra.mxu1 %v3474_v39  ;;  %642 = vmatmul.bf16.vlgmr.msra.gmra.mxu3 %v3528_v18 }
 0x145   :  { %v3542_v28 = vpop.permute.xlu1 %839  ;;  %v3547_v41 = vpop.permute.xlu0 %809 }
 0x146   :  { %859 = vperm.xlu1 %3091, %v371_v29   ;;  %v1578_v29 = vld [vmem:[%s4601_s6 + $0xd8] sm:$0xff] }
 0x147   :  { %690 = vmatpush.bf16.msrb.mxu2 %v426_v35  ;;  %v3015_v35 = vld [vmem:[#allocation4 + $0x94] sm:$0xf0] }
 0x148   :  { %v3554_v44 = vor.u32 %v3015_v35, %v2758_v33  ;;  %1839 = vperm.xlu0 %3090, %v1563_v54   ;;  %v2774_v33 = vld [vmem:[#allocation4 + $0xb0] sm:$0xf]  ;;  %v3019_v35 = vld [vmem:[#allocation4 + $0xb4] sm:$0xf0] }
 0x149   :  { %v3610_v47 = vor.u32 %v3019_v35, %v2774_v33 }
 0x14a   :  { %691 = vmatmul.bf16.vlgmr.msrb.gmra.mxu2 %v3481_v24  ;;  %4664 = vst [vmem:[#allocation19_spill] sm:$0xff] %v3554_v44  ;;  %1934 = vperm.xlu2 %3092, %v1582_v48   ;;  %v3021_v48 = vld [vmem:[#allocation4 + $0xc4] sm:$0xf0] }
 0x14b   :  { %v3560_v27 = vpop.permute.xlu2 %899  ;;  %4668 = vst [vmem:[#allocation23_spill] sm:$0xff] %v3610_v47 }
 0x14d   :  { %v3557_v46 = vpop.permute.xlu1 %829  ;;  %v3564_v51 = vpop.permute.xlu0 %794 }
 0x14e   :  { %1929 = vperm.xlu1 %3091, %v1581_v52  }
 0x150   :  { %1924 = vperm.xlu0 %3090, %v1580_v0  }
 0x153   :  { %v3575_v61 = vpop.permute.xlu2 %884 }
 0x154   :  { %607 = vmatmul.bf16.gmra.mxu1 %v3484_v45  ;;  %647 = vmatmul.bf16.gmra.mxu3 %v3554_v44 }
 0x155   :  { %v3573_v55 = vpop.permute.xlu1 %814  ;;  %v3585_v6 = vpop.permute.xlu0 %889 }
 0x156   :  { %1844 = vperm.xlu1 %3091, %v1564_v62  }
 0x158   :  { %1909 = vperm.xlu0 %3090, %v1577_v19  }
 0x15a   :  { %696 = vmatmul.bf16.gmra.mxu2 %v3487_v25 }
 0x15b   :  { %v790_v36 = vpop.permute.xlu2 %789 }
 0x15d   :  { %v3596_v20 = vpop.permute.xlu1 %909  ;;  %v3602_v34 = vpop.permute.xlu0 %874 }
 0x15e   :  { %1829 = vperm.xlu1 %3091, %v1561_v17   ;;  %v1557_v17 = vld [vmem:[%s4601_s6 + $0x30] sm:$0xff] }
 0x160   :  { %1824 = vperm.xlu0 %3090, %v1560_v31  }
 0x163   :  { %v775_v62 = vpop.permute.xlu2 %774 }
 0x164   :  { %612 = vmatmul.bf16.gmra.mxu1 %v3490_v50  ;;  %652 = vmatmul.bf16.gmra.mxu3 %v3583_v1 }
 0x165   :  { %v3615_v52 = vpop.permute.xlu1 %894  ;;  %v780_v5 = vpop.permute.xlu0 %779 }
 0x166   :  { %1914 = vperm.xlu1 %3091, %v1578_v29  }
 0x168   :  { %1809 = vperm.xlu0 %3090, %v1557_v17  }
 0x16a   :  { %701 = vmatmul.bf16.gmra.mxu2 %v3493_v53 }
 0x16d   :  { %v800_v35 = vpop.permute.xlu1 %799 }
 0x16e   :  { %1899 = vperm.xlu1 %3091, %v1575_v15  }
 0x170   :  { %1894 = vperm.xlu0 %3090, %v1574_v58  }
 0x174   :  { %617 = vmatmul.bf16.gmra.mxu1 %v3496_v56  ;;  %657 = vmatmul.bf16.gmra.mxu3 %v3610_v47 }
 0x175   :  { %v785_v15 = vpop.permute.xlu1 %784 }
 0x176   :  { %1814 = vperm.xlu1 %3091, %v1558_v57  }
 0x17a   :  { %706 = vmatmul.bf16.gmra.mxu2 %v3499_v59 }
 0x184   :  { %622 = vmatmul.bf16.gmra.mxu1 %v3504_v63 }
 0x18a   :  { %711 = vmatmul.bf16.gmra.mxu2 %v3511_v4 }
 0x194   :  { %627 = vmatmul.bf16.gmra.mxu1 %v3518_v9 }
 0x19a   :  { %716 = vmatmul.bf16.gmra.mxu2 %v3521_v12 }
 0x1a4   :  { %632 = vmatmul.bf16.gmra.mxu1 %v3533_v23 }
 0x1aa   :  { %721 = vmatmul.bf16.gmra.mxu2 %v3540_v37 }
 0x1b4   :  { %637 = vmatmul.bf16.gmra.mxu1 %v3549_v26 }
 0x1ba   :  { %726 = vmatmul.bf16.gmra.mxu2 %v3562_v49  ;;  %v3026_v49 = vld [vmem:[#allocation4 + $0xf4] sm:$0xf] }
 0x1c1   :  { %v603_v10 = vpop.f32.mrf.mxu1 }
 0x1c9   :  { %v605_v21 = vpop.f32.mrf.mxu1 }
 0x1ca   :  { %731 = vmatmul.bf16.gmra.mxu2 %v3588_v16 }
 0x1cd   :  { %v692_v42 = vpop.f32.mrf.mxu2 }
 0x1ce   :  { %v693_v43 = vadd.f32 %v692_v42, %v603_v10 }
 0x1d0   :  { %v3626_v19 = vmul.f32 %v775_v62, %v693_v43  ;;  %v2782_v43 = vld [vmem:[#allocation4 + $0xc0] sm:$0xf] }
 0x1d1   :  { %v608_v54 = vpop.f32.mrf.mxu1  ;;  %v3642_v62 = vor.u32 %v3021_v48, %v2782_v43  ;;  %v1555_v43 = vld [vmem:[%s4601_s6 + $0x20] sm:$0xff] }
 0x1d2   :  { %v1571_v48 = vld [vmem:[%s4601_s6 + $0xa0] sm:$0xff]  ;;  %1799 = vperm.xlu1 %3091, %v1555_v43   ;;  %v1576_v43 = vld [vmem:[%s4601_s6 + $0xc8] sm:$0xff] }
 0x1d3   :  { %4670 = vst [vmem:[#allocation25_spill] sm:$0xff] %v3642_v62  ;;  %662 = vmatmul.bf16.gmra.mxu3 %v3642_v62  ;;  %1879 = vperm.xlu0 %3090, %v1571_v48  }
 0x1d5   :  { %v694_v0 = vpop.f32.mrf.mxu2 }
 0x1d6   :  { %v695_v10 = vadd.f32 %v694_v0, %v605_v21  ;;  %v1579_v21 = vld [vmem:[%s4601_s6 + $0xe0] sm:$0xff]  ;;  %v1562_v0 = vld [vmem:[%s4601_s6 + $0x58] sm:$0xff] }
 0x1d7   :  { %1919 = vperm.xlu2 %3092, %v1579_v21  }
 0x1d8   :  { %v3628_v32 = vmul.f32 %v780_v5, %v695_v10  ;;  %v2768_v10 = vld [vmem:[#allocation4 + $0xa8] sm:$0xf0] }
 0x1d9   :  { %v610_v42 = vpop.f32.mrf.mxu1 }
 0x1da   :  { %736 = vmatmul.bf16.gmra.mxu2 %v3618_v11 }
 0x1dd   :  { %v697_v29 = vpop.f32.mrf.mxu2 }
 0x1de   :  { %v698_v31 = vadd.f32 %v697_v29, %v608_v54  ;;  %v3016_v54 = vld [vmem:[#allocation4 + $0xa4] sm:$0xf] }
 0x1df   :  { %1834 = vperm.xlu2 %3092, %v1562_v0   ;;  %v3648_v29 = vor.u32 %v3016_v54, %v2768_v10 }
 0x1e0   :  { %v3656_v57 = vmul.f32 %v785_v15, %v698_v31  ;;  %v3023_v31 = vld [vmem:[#allocation4 + $0xd4] sm:$0xf0] }
 0x1e1   :  { %v613_v5 = vpop.f32.mrf.mxu1  ;;  %4671 = vst [vmem:[#allocation26_spill] sm:$0xff] %v3648_v29  ;;  %v1554_v15 = vld [vmem:[%s4601_s6 + $0x18] sm:$0xff] }
 0x1e2   :  { %1794 = vperm.xlu0 %3090, %v1554_v15  }
 0x1e5   :  { %v699_v17 = vpop.f32.mrf.mxu2 }
 0x1e6   :  { %v700_v21 = vadd.f32 %v699_v17, %v610_v42  ;;  %v1559_v42 = vld [vmem:[%s4601_s6 + $0x40] sm:$0xff]  ;;  %v2790_v17 = vld [vmem:[#allocation4 + $0xd0] sm:$0xf] }
 0x1e7   :  { %1819 = vperm.xlu2 %3092, %v1559_v42   ;;  %v2776_v42 = vld [vmem:[#allocation4 + $0xb8] sm:$0xf0] }
 0x1e8   :  { %v3658_v58 = vmul.f32 %v790_v36, %v700_v21  ;;  %v1572_v36 = vld [vmem:[%s4601_s6 + $0xa8] sm:$0xff]  ;;  %v3672_v21 = vor.u32 %v3023_v31, %v2790_v17  ;;  %v1569_v17 = vld [vmem:[%s4601_s6 + $0x90] sm:$0xff]  ;;  %v1551_v31 = vld [vmem:[%s4601_s6] sm:$0xff] }
 0x1e9   :  { %v615_v33 = vpop.f32.mrf.mxu1  ;;  %1884 = vperm.xlu1 %3091, %v1572_v36  }
 0x1ea   :  { %741 = vmatmul.bf16.gmra.mxu2 %v3648_v29  ;;  %4672 = vst [vmem:[#allocation27_spill] sm:$0xff] %v3672_v21  ;;  %667 = vmatmul.bf16.gmra.mxu3 %v3672_v21 }
 0x1eb   :  { %1779 = vperm.xlu0 %3090, %v1551_v31  }
 0x1ed   :  { %v702_v54 = vpop.f32.mrf.mxu2 }
 0x1ee   :  { %v703_v10 = vadd.f32 %v702_v54, %v613_v5  ;;  %v3018_v5 = vld [vmem:[#allocation4 + $0xb4] sm:$0xf] }
 0x1ef   :  { %1904 = vperm.xlu2 %3092, %v1576_v43   ;;  %v3678_v29 = vor.u32 %v3018_v5, %v2776_v42 }
 0x1f0   :  { %v3687_v36 = vmul.f32 %v3564_v51, %v703_v10  ;;  %v3025_v51 = vld [vmem:[#allocation4 + $0xe4] sm:$0xf0] }
 0x1f1   :  { %v618_v48 = vpop.f32.mrf.mxu1  ;;  %4673 = vst [vmem:[#allocation28_spill] sm:$0xff] %v3678_v29  ;;  %1869 = vperm.xlu1 %3091, %v1569_v17   ;;  %v1556_v17 = vld [vmem:[%s4601_s6 + $0x28] sm:$0xff] }
 0x1f5   :  { %v704_v54 = vpop.f32.mrf.mxu2 }
 0x1f6   :  { %v705_v0 = vadd.f32 %v704_v54, %v615_v33  ;;  %v1573_v33 = vld [vmem:[%s4601_s6 + $0xb0] sm:$0xff]  ;;  %v2798_v54 = vld [vmem:[#allocation4 + $0xe0] sm:$0xf] }
 0x1f7   :  { %1889 = vperm.xlu2 %3092, %v1573_v33   ;;  %v3703_v10 = vor.u32 %v3025_v51, %v2798_v54  ;;  %v2784_v33 = vld [vmem:[#allocation4 + $0xc8] sm:$0xf0] }
 0x1f8   :  { %v3689_v15 = vmul.f32 %v800_v35, %v705_v0  ;;  %v1552_v35 = vld [vmem:[%s4601_s6 + $0x8] sm:$0xff] }
 0x1f9   :  { %v620_v11 = vpop.f32.mrf.mxu1  ;;  %v1568_v0 = vld [vmem:[%s4601_s6 + $0x88] sm:$0xff]  ;;  %4674 = vst [vmem:[#allocation29_spill] sm:$0xff] %v3703_v10  ;;  %1784 = vperm.xlu1 %3091, %v1552_v35   ;;  %v1553_v35 = vld [vmem:[%s4601_s6 + $0x10] sm:$0xff] }
 0x1fa   :  { %746 = vmatmul.bf16.gmra.mxu2 %v3678_v29  ;;  %1864 = vperm.xlu0 %3090, %v1568_v0  }
 0x1fb   :  { %672 = vmatmul.bf16.gmra.mxu3 %v3703_v10 }
 0x1fd   :  { %v707_v5 = vpop.f32.mrf.mxu2 }
 0x1fe   :  { %v708_v42 = vadd.f32 %v707_v5, %v618_v48  ;;  %v3020_v48 = vld [vmem:[#allocation4 + $0xc4] sm:$0xf] }
 0x1ff   :  { %1804 = vperm.xlu2 %3092, %v1556_v17   ;;  %v3709_v29 = vor.u32 %v3020_v48, %v2784_v33  ;;  %v2806_v48 = vld [vmem:[#allocation4 + $0xf0] sm:$0xf]  ;;  %v3027_v33 = vld [vmem:[#allocation4 + $0xf4] sm:$0xf0] }
 0x200   :  { %v3712_v16 = vmul.f32 %v3545_v30, %v708_v42  ;;  %v3723_v30 = vor.u32 %v3027_v33, %v2806_v48  ;;  %v3022_v42 = vld [vmem:[#allocation4 + $0xd4] sm:$0xf]  ;;  %v3024_v48 = vld [vmem:[#allocation4 + $0xe4] sm:$0xf]  ;;  %v2800_v33 = vld [vmem:[#allocation4 + $0xe8] sm:$0xf0] }
 0x201   :  { %v623_v31 = vpop.f32.mrf.mxu1  ;;  %4675 = vst [vmem:[#allocation30_spill] sm:$0xff] %v3709_v29 }
 0x202   :  { %4676 = vst [vmem:[#allocation31_spill] sm:$0xff] %v3723_v30 }
 0x205   :  { %v709_v5 = vpop.f32.mrf.mxu2 }
 0x206   :  { %v710_v43 = vadd.f32 %v709_v5, %v620_v11  ;;  %v2792_v5 = vld [vmem:[#allocation4 + $0xd8] sm:$0xf0] }
 0x207   :  { %1789 = vperm.xlu2 %3092, %v1553_v35   ;;  %v3729_v10 = vor.u32 %v3022_v42, %v2792_v5  ;;  %v643_v5 = vpop.f32.mrf.mxu3 }
 0x208   :  { %v3715_v54 = vmul.f32 %v3547_v41, %v710_v43  ;;  %v1570_v41 = vld [vmem:[%s4601_s6 + $0x98] sm:$0xff] }
 0x209   :  { %v625_v51 = vpop.f32.mrf.mxu1  ;;  %4677 = vst [vmem:[#allocation32_spill] sm:$0xff] %v3729_v10 }
 0x20a   :  { %751 = vmatmul.bf16.gmra.mxu2 %v3709_v29 }
 0x20b   :  { %677 = vmatmul.bf16.gmra.mxu3 %v3723_v30  ;;  %v3735_v30 = vor.u32 %v3024_v48, %v2800_v33 }
 0x20d   :  { %v712_v11 = vpop.f32.mrf.mxu2  ;;  %4678 = vst [vmem:[#allocation33_spill] sm:$0xff] %v3735_v30 }
 0x20e   :  { %v713_v17 = vadd.f32 %v712_v11, %v623_v31  ;;  %v1567_v31 = vld [vmem:[%s4601_s6 + $0x80] sm:$0xff] }
 0x20f   :  { %1874 = vperm.xlu2 %3092, %v1570_v41   ;;  %v3740_v4 = vpop.f32.mrf.mxu3 }
 0x211   :  { %v628_v43 = vpop.f32.mrf.mxu1 }
 0x215   :  { %v714_v29 = vpop.f32.mrf.mxu2 }
 0x217   :  { %1859 = vperm.xlu2 %3092, %v1567_v31   ;;  %v648_v59 = vpop.f32.mrf.mxu3 }
 0x219   :  { %v630_v35 = vpop.f32.mrf.mxu1 }
 0x21a   :  { %756 = vmatmul.bf16.gmra.mxu2 %v3729_v10  ;;  %v2808_v10 = vld [vmem:[#allocation4 + $0xf8] sm:$0xf0] }
 0x21b   :  { %v3738_v37 = vor.u32 %v3026_v49, %v2808_v10 }
 0x21d   :  { %v717_v11 = vpop.f32.mrf.mxu2  ;;  %4679 = vst [vmem:[#allocation34_spill] sm:$0xff] %v3738_v37 }
 0x21e   :  { %v718_v24 = vadd.f32 %v717_v11, %v628_v43 }
 0x21f   :  { %v3747_v23 = vpop.f32.mrf.mxu3 }
 0x221   :  { %v633_v21 = vpop.f32.mrf.mxu1 }
 0x225   :  { %v719_v0 = vpop.f32.mrf.mxu2 }
 0x226   :  { %v720_v18 = vadd.f32 %v719_v0, %v630_v35 }
 0x229   :  { %v635_v42 = vpop.f32.mrf.mxu1 }
 0x22a   :  { %761 = vmatmul.bf16.gmra.mxu2 %v3735_v30 }
 0x22d   :  { %v722_v41 = vpop.f32.mrf.mxu2 }
 0x22e   :  { %v723_v53 = vadd.f32 %v722_v41, %v633_v21 }
 0x230   :  { %v944_v26 = vmul.f32 %v3531_v22, %v723_v53 }
 0x231   :  { %v638_v12 = vpop.f32.mrf.mxu1 }
 0x235   :  { %v724_v62 = vpop.f32.mrf.mxu2 }
 0x236   :  { %v725_v1 = vadd.f32 %v724_v62, %v635_v42  ;;  %v943_v62 = vmul.f32 %v3557_v46, %v720_v18 }
 0x238   :  { %v945_v10 = vmul.f32 %v3542_v28, %v725_v1  ;;  %v940_v28 = vmul.f32 %v3573_v55, %v713_v17  ;;  %v4683_v55 = vpack.c.bf16 %v3628_v32, %v3626_v19 }
 0x239   :  { %v640_v47 = vpop.f32.mrf.mxu1 }
 0x23a   :  { %766 = vmatmul.bf16.gmra.mxu2 %v3738_v37 }
 0x23d   :  { %v727_v31 = vpop.f32.mrf.mxu2 }
 0x23e   :  { %v728_v48 = vadd.f32 %v727_v31, %v638_v12  ;;  %v715_v12 = vadd.f32 %v714_v29, %v625_v51 }
 0x240   :  { %v946_v44 = vmul.f32 %v3502_v60, %v728_v48  ;;  %v942_v60 = vmul.f32 %v3516_v8, %v718_v24  ;;  %v4681_v24 = vpack.c.bf16 %v3689_v15, %v3687_v36  ;;  %v3029_v48 = vld [vmem:[#allocation2 + $0x4] sm:$0xf0] }
 0x245   :  { %v729_v33 = vpop.f32.mrf.mxu2 }
 0x246   :  { %v730_v30 = vadd.f32 %v729_v33, %v640_v47  ;;  %v1002_v47 = vpack.c.bf16 %v945_v10, %v944_v26 }
 0x248   :  { %v947_v25 = vmul.f32 %v3509_v3, %v730_v30  ;;  %v1001_v3 = vpack.c.bf16 %v943_v62, %v942_v60 }
 0x24a   :  { %v1003_v49 = vpack.c.bf16 %v947_v25, %v946_v44  ;;  %v941_v25 = vmul.f32 %v3535_v38, %v715_v12  ;;  %v653_v44 = vpop.f32.mrf.mxu3  ;;  %v4682_v38 = vpack.c.bf16 %v3658_v58, %v3656_v57 }
 0x24c   :  { %1172 = vmatpush.bf16.msrb.mxu3 %v1003_v49  ;;  %v1000_v22 = vpack.c.bf16 %v941_v25, %v940_v28 }
 0x24d   :  { %v732_v37 = vpop.f32.mrf.mxu2 }
 0x24e   :  { %v3749_v31 = vadd.f32 %v732_v37, %v643_v5  ;;  %v4680_v37 = vpack.c.bf16 %v3715_v54, %v3712_v16  ;;  %v2814_v5 = vld [vmem:[#allocation2] sm:$0xf] }
 0x24f   :  { %v3775_v49 = vor.u32 %v3029_v48, %v2814_v5 }
 0x250   :  { %1173 = vmatpush.bf16.msrb.mxu3 %v1002_v47 }
 0x252   :  { %v655_v8 = vpop.f32.mrf.mxu3 }
 0x254   :  { %1174 = vmatpush.bf16.msrb.mxu3 %v1001_v3 }
 0x255   :  { %v3755_v53 = vpop.f32.mrf.mxu2 }
 0x258   :  { %1175 = vmatpush.bf16.msrb.mxu3 %v1000_v22 }
 0x25a   :  { %v658_v1 = vpop.f32.mrf.mxu3 }
 0x25c   :  { %1176 = vmatpush.bf16.msrb.mxu3 %v4680_v37 }
 0x25d   :  { %v737_v26 = vpop.f32.mrf.mxu2 }
 0x25e   :  { %v3760_v18 = vadd.f32 %v737_v26, %v648_v59 }
 0x260   :  { %1177 = vmatpush.bf16.msrb.mxu3 %v4681_v24  ;;  %v2822_v24 = vld [vmem:[#allocation2 + $0x10] sm:$0xf] }
 0x262   :  { %v660_v21 = vpop.f32.mrf.mxu3 }
 0x264   :  { %1178 = vmatpush.bf16.msrb.mxu3 %v4682_v38  ;;  %v3031_v38 = vld [vmem:[#allocation2 + $0x14] sm:$0xf0] }
 0x265   :  { %v3768_v46 = vpop.f32.mrf.mxu2 }
 0x268   :  { %1179 = vmatpush.bf16.msrb.mxu3 %v4683_v55  ;;  %v3781_v55 = vor.u32 %v3031_v38, %v2822_v24  ;;  %v2862_v38 = vld [vmem:[#allocation2 + $0x60] sm:$0xf] }
 0x26a   :  { %v663_v15 = vpop.f32.mrf.mxu3 }
 0x26b   :  { %1180 = vmatmul.bf16.vlgmr.msrb.gmra.mxu3 %v3775_v49 }
 0x26d   :  { %v742_v16 = vpop.f32.mrf.mxu2 }
 0x26e   :  { %v3773_v29 = vadd.f32 %v742_v16, %v653_v44 }
 0x272   :  { %v665_v0 = vpop.f32.mrf.mxu3 }
 0x275   :  { %v744_v59 = vpop.f32.mrf.mxu2 }
 0x27a   :  { %v668_v58 = vpop.f32.mrf.mxu3 }
 0x27b   :  { %1185 = vmatmul.bf16.gmra.mxu3 %v3781_v55 }
 0x27d   :  { %v747_v54 = vpop.f32.mrf.mxu2 }
 0x27e   :  { %v748_v36 = vadd.f32 %v747_v54, %v658_v1  ;;  %v880_v54 = vpop.permute.xlu1 %879 }
 0x282   :  { %v670_v43 = vpop.f32.mrf.mxu3 }
 0x285   :  { %v749_v51 = vpop.f32.mrf.mxu2 }
 0x28a   :  { %v673_v19 = vpop.f32.mrf.mxu3 }
 0x28d   :  { %v752_v17 = vpop.f32.mrf.mxu2 }
 0x28e   :  { %v753_v57 = vadd.f32 %v752_v17, %v663_v15 }
 0x292   :  { %v675_v41 = vpop.f32.mrf.mxu3 }
 0x295   :  { %v754_v30 = vpop.f32.mrf.mxu2 }
 0x296   :  { %v755_v15 = vadd.f32 %v754_v30, %v665_v0  ;;  %v954_v0 = vmul.f32 %v3575_v61, %v748_v36  ;;  %v735_v61 = vadd.f32 %v3755_v53, %v3740_v4  ;;  %v3035_v4 = vld [vmem:[#allocation2 + $0x34] sm:$0xf0] }
 0x29a   :  { %v678_v33 = vpop.f32.mrf.mxu3 }
 0x29d   :  { %v757_v35 = vpop.f32.mrf.mxu2 }
 0x29e   :  { %v758_v1 = vadd.f32 %v757_v35, %v668_v58  ;;  %v745_v58 = vadd.f32 %v744_v59, %v655_v8 }
 0x2a0   :  { %v953_v30 = vmul.f32 %v880_v54, %v745_v58  ;;  %v3036_v54 = vld [vmem:[#allocation2 + $0x44] sm:$0xf] }
 0x2a2   :  { %v680_v47 = vpop.f32.mrf.mxu3 }
 0x2a5   :  { %v759_v11 = vpop.f32.mrf.mxu2 }
 0x2a6   :  { %v760_v44 = vadd.f32 %v759_v11, %v670_v43  ;;  %v750_v43 = vadd.f32 %v749_v51, %v660_v21  ;;  %v957_v11 = vmul.f32 %v3560_v27, %v755_v15  ;;  %v2830_v21 = vld [vmem:[#allocation2 + $0x20] sm:$0xf]  ;;  %v3033_v51 = vld [vmem:[#allocation2 + $0x24] sm:$0xf0]  ;;  %v952_v27 = vmul.f32 %v3602_v34, %v3773_v29  ;;  %v3028_v34 = vld [vmem:[#allocation2 + $0x4] sm:$0xf] }
 0x2a7   :  { %v2816_v29 = vld [vmem:[#allocation2 + $0x8] sm:$0xf0] }
 0x2a8   :  { %v955_v35 = vmul.f32 %v3585_v6, %v750_v43  ;;  %v1006_v6 = vpack.c.bf16 %v953_v30, %v952_v27  ;;  %v3802_v48 = vor.u32 %v3028_v34, %v2816_v29  ;;  %v2848_v15 = vld [vmem:[#allocation2 + $0x48] sm:$0xf0]  ;;  %v3064_v30 = vld [vmem:[%s4600_s5 + $0x20] sm:$0xff]  ;;  %v3063_v27 = vld [vmem:[%s4600_s5 + $0x18] sm:$0xff] }
 0x2a9   :  { %v2872_v34 = vld [vmem:[#allocation2 + $0x78] sm:$0xf0] }
 0x2aa   :  { %4684 = vst [vmem:[#allocation35_spill] sm:$0xff] %v3802_v48 }
 0x2ad   :  { %v762_v32 = vpop.f32.mrf.mxu2 }
 0x2ae   :  { %v763_v25 = vadd.f32 %v762_v32, %v673_v19  ;;  %v956_v19 = vmul.f32 %v3615_v52, %v753_v57  ;;  %v865_v32 = vpop.permute.xlu1 %864  ;;  %v870_v52 = vpop.permute.xlu2 %869 }
 0x2af   :  { %v855_v57 = vpop.permute.xlu0 %854 }
 0x2b0   :  { %v960_v16 = vmul.f32 %v3523_v13, %v763_v25  ;;  %v1008_v13 = vpack.c.bf16 %v957_v11, %v956_v19  ;;  %v3038_v11 = vld [vmem:[#allocation2 + $0x54] sm:$0xf]  ;;  %v2856_v19 = vld [vmem:[#allocation2 + $0x58] sm:$0xf0] }
 0x2b1   :  { %v3835_v58 = vor.u32 %v3038_v11, %v2856_v19  ;;  %v2888_v11 = vld [vmem:[#allocation2 + $0x98] sm:$0xf0] }
 0x2b3   :  { %4690 = vst [vmem:[#allocation41_spill] sm:$0xff] %v3835_v58 }
 0x2b5   :  { %v764_v42 = vpop.f32.mrf.mxu2 }
 0x2b6   :  { %v765_v60 = vadd.f32 %v764_v42, %v675_v41  ;;  %v3793_v41 = vor.u32 %v3033_v51, %v2830_v21  ;;  %v948_v42 = vmul.f32 %v855_v57, %v3749_v31  ;;  %v2846_v31 = vld [vmem:[#allocation2 + $0x40] sm:$0xf]  ;;  %v3040_v21 = vld [vmem:[#allocation2 + $0x64] sm:$0xf]  ;;  %v2864_v51 = vld [vmem:[#allocation2 + $0x68] sm:$0xf0] }
 0x2b7   :  { %v3060_v57 = vld [vmem:[%s4600_s5] sm:$0xff] }
 0x2b8   :  { %v961_v26 = vmul.f32 %v3525_v14, %v765_v60  ;;  %1190 = vmatmul.bf16.gmra.mxu3 %v3793_v41  ;;  %v3032_v60 = vld [vmem:[#allocation2 + $0x24] sm:$0xf] }
 0x2ba   :  { %v1010_v17 = vpack.c.bf16 %v961_v26, %v960_v16  ;;  %v2840_v26 = vld [vmem:[#allocation2 + $0x38] sm:$0xf0] }
 0x2bd   :  { %v767_v10 = vpop.f32.mrf.mxu2 }
 0x2be   :  { %v768_v12 = vadd.f32 %v767_v10, %v678_v33  ;;  %v2838_v33 = vld [vmem:[#allocation2 + $0x30] sm:$0xf]  ;;  %v2824_v10 = vld [vmem:[#allocation2 + $0x18] sm:$0xf0] }
 0x2bf   :  { %v3805_v53 = vor.u32 %v3035_v4, %v2838_v33  ;;  %v2894_v33 = vld [vmem:[#allocation2 + $0xa0] sm:$0xf]  ;;  %v3049_v4 = vld [vmem:[#allocation2 + $0xa4] sm:$0xf0] }
 0x2c0   :  { %v962_v28 = vmul.f32 %v3506_v2, %v768_v12  ;;  %v959_v2 = vmul.f32 %v3596_v20, %v760_v44  ;;  %v740_v20 = vadd.f32 %v3768_v46, %v3747_v23  ;;  %v950_v23 = vmul.f32 %v865_v32, %v3760_v18  ;;  %v860_v46 = vpop.permute.xlu1 %859  ;;  %v3030_v18 = vld [vmem:[#allocation2 + $0x14] sm:$0xf]  ;;  %v3045_v32 = vld [vmem:[#allocation2 + $0x84] sm:$0xf0] }
 0x2c1   :  { %v949_v36 = vmul.f32 %v860_v46, %v735_v61  ;;  %v3808_v12 = vor.u32 %v3030_v18, %v2824_v10  ;;  %v3871_v18 = vor.u32 %v3049_v4, %v2894_v33  ;;  %v2918_v4 = vld [vmem:[#allocation2 + $0xd0] sm:$0xf] }
 0x2c2   :  { %v951_v8 = vmul.f32 %v870_v52, %v740_v20  ;;  %v3065_v20 = vld [vmem:[%s4600_s5 + $0x28] sm:$0xff]  ;;  %v3853_v52 = vor.u32 %v3040_v21, %v2864_v51 }
 0x2c3   :  { %v1004_v5 = vpack.c.bf16 %v949_v36, %v948_v42  ;;  %4685 = vst [vmem:[#allocation36_spill] sm:$0xff] %v3808_v12  ;;  %v3042_v42 = vld [vmem:[#allocation2 + $0x74] sm:$0xf] }
 0x2c4   :  { %v1005_v59 = vpack.c.bf16 %v951_v8, %v950_v23  ;;  %4692 = vst [vmem:[#allocation43_spill] sm:$0xff] %v3853_v52  ;;  %v2886_v8 = vld [vmem:[#allocation2 + $0x90] sm:$0xf]  ;;  %v3047_v23 = vld [vmem:[#allocation2 + $0x94] sm:$0xf0]  ;;  %v3868_v29 = vor.u32 %v3042_v42, %v2872_v34 }
 0x2c5   :  { %v769_v62 = vpop.f32.mrf.mxu2  ;;  %v3859_v46 = vor.u32 %v3047_v23, %v2886_v8  ;;  %4695 = vst [vmem:[#allocation46_spill] sm:$0xff] %v3871_v18  ;;  %v3048_v23 = vld [vmem:[#allocation2 + $0xa4] sm:$0xf] }
 0x2c6   :  { %v770_v3 = vadd.f32 %v769_v62, %v680_v47  ;;  %v3037_v47 = vld [vmem:[#allocation2 + $0x44] sm:$0xf0]  ;;  %4694 = vst [vmem:[#allocation45_spill] sm:$0xff] %v3868_v29 }
 0x2c7   :  { %v3811_v62 = vor.u32 %v3037_v47, %v2846_v31  ;;  %4693 = vst [vmem:[#allocation44_spill] sm:$0xff] %v3859_v46  ;;  %v3044_v31 = vld [vmem:[#allocation2 + $0x84] sm:$0xf]  ;;  %v2880_v47 = vld [vmem:[#allocation2 + $0x88] sm:$0xf0] }
 0x2c8   :  { %v963_v22 = vmul.f32 %v3514_v7, %v770_v3  ;;  %v958_v7 = vmul.f32 %v3537_v40, %v758_v1  ;;  %v1007_v40 = vpack.c.bf16 %v955_v35, %v954_v0  ;;  %1195 = vmatmul.bf16.gmra.mxu3 %v3805_v53  ;;  %v2832_v3 = vld [vmem:[#allocation2 + $0x28] sm:$0xf0]  ;;  %v3041_v1 = vld [vmem:[#allocation2 + $0x64] sm:$0xf0]  ;;  %v2878_v35 = vld [vmem:[#allocation2 + $0x80] sm:$0xf] }
 0x2c9   :  { %v3814_v25 = vor.u32 %v3032_v60, %v2832_v3  ;;  %v3823_v16 = vor.u32 %v3041_v1, %v2862_v38  ;;  %v3841_v0 = vor.u32 %v3045_v32, %v2878_v35  ;;  %v3874_v60 = vor.u32 %v3044_v31, %v2880_v47  ;;  %v3055_v31 = vld [vmem:[#allocation2 + $0xd4] sm:$0xf0] }
 0x2ca   :  { %v1011_v37 = vpack.c.bf16 %v963_v22, %v962_v28  ;;  %v1009_v14 = vpack.c.bf16 %v959_v2, %v958_v7  ;;  %v2854_v28 = vld [vmem:[#allocation2 + $0x50] sm:$0xf]  ;;  %v3039_v22 = vld [vmem:[#allocation2 + $0x54] sm:$0xf0]  ;;  %v3889_v47 = vor.u32 %v3055_v31, %v2918_v4 }
 0x2cb   :  { %4686 = vst [vmem:[#allocation37_spill] sm:$0xff] %v3814_v25  ;;  %v3817_v44 = vor.u32 %v3039_v22, %v2854_v28  ;;  %v2870_v2 = vld [vmem:[#allocation2 + $0x70] sm:$0xf]  ;;  %v3043_v7 = vld [vmem:[#allocation2 + $0x74] sm:$0xf0] }
 0x2cc   :  { %1261 = vmatpush.bf16.msrb.mxu0 %v1011_v37  ;;  %v3034_v37 = vld [vmem:[#allocation2 + $0x34] sm:$0xf]  ;;  %v3829_v43 = vor.u32 %v3043_v7, %v2870_v2  ;;  %4691 = vst [vmem:[#allocation42_spill] sm:$0xff] %v3841_v0  ;;  %v2902_v22 = vld [vmem:[#allocation2 + $0xb0] sm:$0xf] }
 0x2cd   :  { %v3820_v24 = vor.u32 %v3034_v37, %v2840_v26  ;;  %4696 = vst [vmem:[#allocation47_spill] sm:$0xff] %v3874_v60  ;;  %v3051_v37 = vld [vmem:[#allocation2 + $0xb4] sm:$0xf0] }
 0x2ce   :  { %4689 = vst [vmem:[#allocation40_spill] sm:$0xff] %v3829_v43  ;;  %v3877_v26 = vor.u32 %v3051_v37, %v2902_v22  ;;  %v3059_v4 = vld [vmem:[#allocation2 + $0xf4] sm:$0xf0] }
 0x2cf   :  { %4687 = vst [vmem:[#allocation38_spill] sm:$0xff] %v3820_v24 }
 0x2d0   :  { %1262 = vmatpush.bf16.msrb.mxu0 %v1010_v17  ;;  %v3826_v17 = vor.u32 %v3036_v54, %v2848_v15  ;;  %4697 = vst [vmem:[#allocation48_spill] sm:$0xff] %v3877_v26 }
 0x2d1   :  { %4701 = vst [vmem:[#allocation52_spill] sm:$0xff] %v3889_v47 }
 0x2d2   :  { %4688 = vst [vmem:[#allocation39_spill] sm:$0xff] %v3826_v17 }
 0x2d4   :  { %1263 = vmatpush.bf16.msrb.mxu0 %v1009_v14  ;;  %v3067_v14 = vld [vmem:[%s4600_s5 + $0x38] sm:$0xff] }
 0x2d5   :  { %1462 = vmatpush.bf16.msrb.mxu1 %v3067_v14  ;;  %v3046_v14 = vld [vmem:[#allocation2 + $0x94] sm:$0xf] }
 0x2d8   :  { %1264 = vmatpush.bf16.msrb.mxu0 %v1008_v13  ;;  %1200 = vmatmul.bf16.gmra.mxu3 %v3811_v62  ;;  %v3066_v13 = vld [vmem:[%s4600_s5 + $0x30] sm:$0xff] }
 0x2d9   :  { %1463 = vmatpush.bf16.msrb.mxu1 %v3066_v13  ;;  %v3880_v13 = vor.u32 %v3046_v14, %v2888_v11 }
 0x2db   :  { %4698 = vst [vmem:[#allocation49_spill] sm:$0xff] %v3880_v13 }
 0x2dc   :  { %1265 = vmatpush.bf16.msrb.mxu0 %v1007_v40 }
 0x2dd   :  { %1464 = vmatpush.bf16.msrb.mxu1 %v3065_v20  ;;  %v2910_v20 = vld [vmem:[#allocation2 + $0xc0] sm:$0xf] }
 0x2e0   :  { %1266 = vmatpush.bf16.msrb.mxu0 %v1006_v6  ;;  %v3062_v6 = vld [vmem:[%s4600_s5 + $0x10] sm:$0xff] }
 0x2e1   :  { %1465 = vmatpush.bf16.msrb.mxu1 %v3064_v30  ;;  %v3053_v30 = vld [vmem:[#allocation2 + $0xc4] sm:$0xf0] }
 0x2e2   :  { %v3883_v21 = vor.u32 %v3053_v30, %v2910_v20 }
 0x2e4   :  { %1267 = vmatpush.bf16.msrb.mxu0 %v1005_v59  ;;  %v3061_v59 = vld [vmem:[%s4600_s5 + $0x8] sm:$0xff]  ;;  %4699 = vst [vmem:[#allocation50_spill] sm:$0xff] %v3883_v21 }
 0x2e5   :  { %1466 = vmatpush.bf16.msrb.mxu1 %v3063_v27 }
 0x2e8   :  { %1268 = vmatpush.bf16.msrb.mxu0 %v1004_v5  ;;  %1205 = vmatmul.bf16.gmra.mxu3 %v3817_v44 }
 0x2e9   :  { %1467 = vmatpush.bf16.msrb.mxu1 %v3062_v6 }
 0x2eb   :  { %1269 = vmatmul.bf16.vlgmr.msrb.gmra.mxu0 %v3802_v48 }
 0x2ed   :  { %1468 = vmatpush.bf16.msrb.mxu1 %v3061_v59  ;;  %v2896_v59 = vld [vmem:[#allocation2 + $0xa8] sm:$0xf0] }
 0x2ee   :  { %v1181_v40 = vpop.f32.mrf.mxu3  ;;  %v3886_v42 = vor.u32 %v3048_v23, %v2896_v59 }
 0x2f0   :  { %4700 = vst [vmem:[#allocation51_spill] sm:$0xff] %v3886_v42 }
 0x2f1   :  { %1469 = vmatpush.bf16.msrb.mxu1 %v3060_v57 }
 0x2f6   :  { %v1183_v61 = vpop.f32.mrf.mxu3 }
 0x2f8   :  { %1210 = vmatmul.bf16.gmra.mxu3 %v3823_v16 }
 0x2fb   :  { %1274 = vmatmul.bf16.gmra.mxu0 %v3808_v12  ;;  %v4739_v12 = vld [vmem:[#allocation33_spill] sm:$0xff] }
 0x2fe   :  { %v1186_v36 = vpop.f32.mrf.mxu3 }
 0x306   :  { %v1188_v5 = vpop.f32.mrf.mxu3 }
 0x308   :  { %1215 = vmatmul.bf16.gmra.mxu3 %v3829_v43 }
 0x30b   :  { %1279 = vmatmul.bf16.gmra.mxu0 %v3814_v25 }
 0x318   :  { %1220 = vmatmul.bf16.gmra.mxu3 %v3841_v0 }
 0x31b   :  { %1284 = vmatmul.bf16.gmra.mxu0 %v3820_v24 }
 0x328   :  { %1225 = vmatmul.bf16.gmra.mxu3 %v3859_v46 }
 0x32b   :  { %1289 = vmatmul.bf16.gmra.mxu0 %v3826_v17 }
 0x338   :  { %1230 = vmatmul.bf16.gmra.mxu3 %v3871_v18 }
 0x33b   :  { %1294 = vmatmul.bf16.gmra.mxu0 %v3835_v58  ;;  %v1191_v10 = vpop.f32.mrf.mxu3 }
 0x343   :  { %v1193_v28 = vpop.f32.mrf.mxu3 }
 0x348   :  { %1235 = vmatmul.bf16.gmra.mxu3 %v3877_v26 }
 0x34b   :  { %1299 = vmatmul.bf16.gmra.mxu0 %v3853_v52  ;;  %v1196_v54 = vpop.f32.mrf.mxu3 }
 0x353   :  { %v1198_v32 = vpop.f32.mrf.mxu3 }
 0x358   :  { %1240 = vmatmul.bf16.gmra.mxu3 %v3883_v21 }
 0x35b   :  { %1304 = vmatmul.bf16.gmra.mxu0 %v3868_v29  ;;  %v1201_v27 = vpop.f32.mrf.mxu3 }
 0x363   :  { %v1203_v33 = vpop.f32.mrf.mxu3 }
 0x368   :  { %v1270_v3 = vpop.f32.mrf.mxu0  ;;  %1245 = vmatmul.bf16.gmra.mxu3 %v3889_v47 }
 0x369   :  { %v1271_v38 = vadd.f32 %v1270_v3, %v1181_v40 }
 0x36b   :  { %1309 = vmatmul.bf16.gmra.mxu0 %v3874_v60  ;;  %v1350_v2 = vmax.f32 %v1271_v38, 0.0  ;;  %v1206_v3 = vpop.f32.mrf.mxu3 }
 0x370   :  { %v1272_v1 = vpop.f32.mrf.mxu0 }
 0x371   :  { %v1273_v15 = vadd.f32 %v1272_v1, %v1183_v61  ;;  %v3050_v1 = vld [vmem:[#allocation2 + $0xb4] sm:$0xf] }
 0x373   :  { %v1351_v7 = vmax.f32 %v1273_v15, 0.0  ;;  %v2904_v15 = vld [vmem:[#allocation2 + $0xb8] sm:$0xf0]  ;;  %v1208_v11 = vpop.f32.mrf.mxu3 }
 0x375   :  { %v1382_v19 = vpack.c.bf16 %v1351_v7, %v1350_v2  ;;  %v3892_v7 = vor.u32 %v3050_v1, %v2904_v15  ;;  %v2920_v1 = vld [vmem:[#allocation2 + $0xd8] sm:$0xf0] }
 0x377   :  { %1470 = vmatmul.bf16.vlgmr.msrb.gmra.mxu1 %v1382_v19  ;;  %4702 = vst [vmem:[#allocation53_spill] sm:$0xff] %v3892_v7  ;;  %v2926_v19 = vld [vmem:[#allocation2 + $0xe0] sm:$0xf] }
 0x378   :  { %v1275_v35 = vpop.f32.mrf.mxu0 }
 0x379   :  { %v1276_v40 = vadd.f32 %v1275_v35, %v1186_v36  ;;  %v3057_v35 = vld [vmem:[#allocation2 + $0xe4] sm:$0xf0] }
 0x37a   :  { %v3895_v20 = vor.u32 %v3057_v35, %v2926_v19 }
 0x37b   :  { %1314 = vmatmul.bf16.gmra.mxu0 %v3880_v13  ;;  %v1352_v6 = vmax.f32 %v1276_v40, 0.0  ;;  %v1211_v40 = vpop.f32.mrf.mxu3 }
 0x37c   :  { %4703 = vst [vmem:[#allocation54_spill] sm:$0xff] %v3895_v20  ;;  %1250 = vmatmul.bf16.gmra.mxu3 %v3895_v20 }
 0x380   :  { %v1277_v51 = vpop.f32.mrf.mxu0 }
 0x381   :  { %v1278_v61 = vadd.f32 %v1277_v51, %v1188_v5 }
 0x383   :  { %v1353_v8 = vmax.f32 %v1278_v61, 0.0 }
 0x385   :  { %v1383_v57 = vpack.c.bf16 %v1353_v8, %v1352_v6  ;;  %v3052_v6 = vld [vmem:[#allocation2 + $0xc4] sm:$0xf]  ;;  %v2912_v8 = vld [vmem:[#allocation2 + $0xc8] sm:$0xf0] }
 0x386   :  { %v3898_v59 = vor.u32 %v3052_v6, %v2912_v8 }
 0x387   :  { %1475 = vmatmul.bf16.gmra.mxu1 %v1383_v57 }
 0x388   :  { %v1280_v34 = vpop.f32.mrf.mxu0  ;;  %4704 = vst [vmem:[#allocation55_spill] sm:$0xff] %v3898_v59 }
 0x389   :  { %v1281_v36 = vadd.f32 %v1280_v34, %v1191_v10  ;;  %v2934_v34 = vld [vmem:[#allocation2 + $0xf0] sm:$0xf] }
 0x38a   :  { %v3901_v31 = vor.u32 %v3059_v4, %v2934_v34 }
 0x38b   :  { %1319 = vmatmul.bf16.gmra.mxu0 %v3886_v42  ;;  %v1354_v37 = vmax.f32 %v1281_v36, 0.0  ;;  %v1213_v36 = vpop.f32.mrf.mxu3 }
 0x38c   :  { %4705 = vst [vmem:[#allocation56_spill] sm:$0xff] %v3901_v31  ;;  %1255 = vmatmul.bf16.gmra.mxu3 %v3901_v31 }
 0x390   :  { %v1282_v5 = vpop.f32.mrf.mxu0 }
 0x391   :  { %v1283_v22 = vadd.f32 %v1282_v5, %v1193_v28 }
 0x393   :  { %v1355_v38 = vmax.f32 %v1283_v22, 0.0 }
 0x395   :  { %v1384_v2 = vpack.c.bf16 %v1355_v38, %v1354_v37  ;;  %v3054_v38 = vld [vmem:[#allocation2 + $0xd4] sm:$0xf] }
 0x397   :  { %1480 = vmatmul.bf16.gmra.mxu1 %v1384_v2  ;;  %v1216_v2 = vpop.f32.mrf.mxu3 }
 0x398   :  { %v1285_v14 = vpop.f32.mrf.mxu0 }
 0x399   :  { %v1286_v10 = vadd.f32 %v1285_v14, %v1196_v54  ;;  %v3904_v14 = vor.u32 %v3054_v38, %v2920_v1 }
 0x39b   :  { %1324 = vmatmul.bf16.gmra.mxu0 %v3892_v7  ;;  %v1356_v51 = vmax.f32 %v1286_v10, 0.0  ;;  %4706 = vst [vmem:[#allocation57_spill] sm:$0xff] %v3904_v14 }
 0x3a0   :  { %v1287_v28 = vpop.f32.mrf.mxu0 }
 0x3a1   :  { %v1288_v30 = vadd.f32 %v1287_v28, %v1198_v32  ;;  %v1218_v28 = vpop.f32.mrf.mxu3 }
 0x3a3   :  { %v1357_v61 = vmax.f32 %v1288_v30, 0.0 }
 0x3a5   :  { %v1385_v23 = vpack.c.bf16 %v1357_v61, %v1356_v51  ;;  %v3056_v61 = vld [vmem:[#allocation2 + $0xe4] sm:$0xf] }
 0x3a7   :  { %1485 = vmatmul.bf16.gmra.mxu1 %v1385_v23 }
 0x3a8   :  { %v1290_v57 = vpop.f32.mrf.mxu0 }
 0x3a9   :  { %v1291_v54 = vadd.f32 %v1290_v57, %v1201_v27  ;;  %v1221_v57 = vpop.f32.mrf.mxu3 }
 0x3ab   :  { %1329 = vmatmul.bf16.gmra.mxu0 %v3898_v59  ;;  %v1358_v22 = vmax.f32 %v1291_v54, 0.0 }
 0x3b0   :  { %v1292_v32 = vpop.f32.mrf.mxu0 }
 0x3b1   :  { %v1293_v5 = vadd.f32 %v1292_v32, %v1203_v33  ;;  %v2928_v33 = vld [vmem:[#allocation2 + $0xe8] sm:$0xf0] }
 0x3b2   :  { %v3907_v8 = vor.u32 %v3056_v61, %v2928_v33 }
 0x3b3   :  { %v1359_v37 = vmax.f32 %v1293_v5, 0.0  ;;  %v3058_v5 = vld [vmem:[#allocation2 + $0xf4] sm:$0xf] }
 0x3b4   :  { %4707 = vst [vmem:[#allocation58_spill] sm:$0xff] %v3907_v8 }
 0x3b5   :  { %v1386_v15 = vpack.c.bf16 %v1359_v37, %v1358_v22  ;;  %v2936_v22 = vld [vmem:[#allocation2 + $0xf8] sm:$0xf0] }
 0x3b6   :  { %v3910_v38 = vor.u32 %v3058_v5, %v2936_v22 }
 0x3b7   :  { %1490 = vmatmul.bf16.gmra.mxu1 %v1386_v15 }
 0x3b8   :  { %v1295_v19 = vpop.f32.mrf.mxu0  ;;  %4708 = vst [vmem:[#allocation59_spill] sm:$0xff] %v3910_v38 }
 0x3b9   :  { %v1296_v35 = vadd.f32 %v1295_v19, %v1206_v3 }
 0x3bb   :  { %1334 = vmatmul.bf16.gmra.mxu0 %v3904_v14  ;;  %v1360_v51 = vmax.f32 %v1296_v35, 0.0 }
 0x3c0   :  { %v1297_v10 = vpop.f32.mrf.mxu0 }
 0x3c1   :  { %v1298_v30 = vadd.f32 %v1297_v10, %v1208_v11  ;;  %v1223_v11 = vpop.f32.mrf.mxu3 }
 0x3c3   :  { %v1361_v27 = vmax.f32 %v1298_v30, 0.0 }
 0x3c5   :  { %v1387_v6 = vpack.c.bf16 %v1361_v27, %v1360_v51 }
 0x3c7   :  { %1495 = vmatmul.bf16.gmra.mxu1 %v1387_v6 }
 0x3c8   :  { %v1300_v23 = vpop.f32.mrf.mxu0 }
 0x3c9   :  { %v1301_v34 = vadd.f32 %v1300_v23, %v1211_v40  ;;  %v1226_v15 = vpop.f32.mrf.mxu3 }
 0x3cb   :  { %1339 = vmatmul.bf16.gmra.mxu0 %v3907_v8  ;;  %v1362_v32 = vmax.f32 %v1301_v34, 0.0 }
 0x3d0   :  { %v1302_v4 = vpop.f32.mrf.mxu0 }
 0x3d1   :  { %v1303_v54 = vadd.f32 %v1302_v4, %v1213_v36  ;;  %v1228_v27 = vpop.f32.mrf.mxu3 }
 0x3d3   :  { %v1363_v3 = vmax.f32 %v1303_v54, 0.0 }
 0x3d5   :  { %v1388_v37 = vpack.c.bf16 %v1363_v3, %v1362_v32 }
 0x3d7   :  { %1500 = vmatmul.bf16.gmra.mxu1 %v1388_v37 }
 0x3d8   :  { %v1305_v1 = vpop.f32.mrf.mxu0 }
 0x3d9   :  { %v1306_v19 = vadd.f32 %v1305_v1, %v1216_v2  ;;  %v1231_v23 = vpop.f32.mrf.mxu3 }
 0x3db   :  { %1344 = vmatmul.bf16.gmra.mxu0 %v3910_v38  ;;  %v1364_v30 = vmax.f32 %v1306_v19, 0.0 }
 0x3e0   :  { %v1307_v35 = vpop.f32.mrf.mxu0 }
 0x3e1   :  { %v1308_v10 = vadd.f32 %v1307_v35, %v1218_v28  ;;  %v1233_v28 = vpop.f32.mrf.mxu3 }
 0x3e3   :  { %v1365_v40 = vmax.f32 %v1308_v10, 0.0 }
 0x3e5   :  { %v1389_v51 = vpack.c.bf16 %v1365_v40, %v1364_v30 }
 0x3e7   :  { %1505 = vmatmul.bf16.gmra.mxu1 %v1389_v51 }
 0x3e8   :  { %v1310_v36 = vpop.f32.mrf.mxu0 }
 0x3e9   :  { %v1311_v61 = vadd.f32 %v1310_v36, %v1221_v57  ;;  %v1236_v10 = vpop.f32.mrf.mxu3 }
 0x3eb   :  { %v1366_v34 = vmax.f32 %v1311_v61, 0.0 }
 0x3f0   :  { %v1312_v33 = vpop.f32.mrf.mxu0 }
 0x3f1   :  { %v1313_v6 = vadd.f32 %v1312_v33, %v1223_v11  ;;  %v1238_v33 = vpop.f32.mrf.mxu3 }
 0x3f3   :  { %v1367_v4 = vmax.f32 %v1313_v6, 0.0 }
 0x3f4   :  { %v3913_v54 = vpop.f32.mrf.mxu1 }
 0x3f5   :  { %v1390_v32 = vpack.c.bf16 %v1367_v4, %v1366_v34 }
 0x3f7   :  { %1510 = vmatmul.bf16.gmra.mxu1 %v1390_v32 }
 0x3f8   :  { %v1315_v3 = vpop.f32.mrf.mxu0 }
 0x3f9   :  { %v1316_v22 = vadd.f32 %v1315_v3, %v1226_v15  ;;  %v1241_v3 = vpop.f32.mrf.mxu3 }
 0x3fb   :  { %v1368_v57 = vmax.f32 %v1316_v22, 0.0 }
 0x3fc   :  { %v3915_v2 = vpop.f32.mrf.mxu1 }
 0x400   :  { %v1317_v37 = vpop.f32.mrf.mxu0 }
 0x401   :  { %v1318_v1 = vadd.f32 %v1317_v37, %v1228_v27 }
 0x403   :  { %v1369_v19 = vmax.f32 %v1318_v1, 0.0 }
 0x404   :  { %v3919_v11 = vpop.f32.mrf.mxu1 }
 0x405   :  { %v1391_v35 = vpack.c.bf16 %v1369_v19, %v1368_v57 }
 0x407   :  { %1515 = vmatmul.bf16.gmra.mxu1 %v1391_v35 }
 0x408   :  { %v1320_v30 = vpop.f32.mrf.mxu0 }
 0x409   :  { %v1321_v36 = vadd.f32 %v1320_v30, %v1231_v23 }
 0x40b   :  { %v1370_v15 = vmax.f32 %v1321_v36, 0.0 }
 0x40c   :  { %v3921_v40 = vpop.f32.mrf.mxu1 }
 0x410   :  { %v1322_v61 = vpop.f32.mrf.mxu0 }
 0x411   :  { %v1323_v6 = vadd.f32 %v1322_v61, %v1233_v28  ;;  %v1243_v28 = vpop.f32.mrf.mxu3 }
 0x413   :  { %v1371_v34 = vmax.f32 %v1323_v6, 0.0 }
 0x414   :  { %v3925_v27 = vpop.f32.mrf.mxu1 }
 0x415   :  { %v1392_v4 = vpack.c.bf16 %v1371_v34, %v1370_v15 }
 0x417   :  { %1520 = vmatmul.bf16.gmra.mxu1 %v1392_v4 }
 0x418   :  { %v1325_v32 = vpop.f32.mrf.mxu0 }
 0x419   :  { %v1326_v1 = vadd.f32 %v1325_v32, %v1236_v10  ;;  %v1246_v34 = vpop.f32.mrf.mxu3 }
 0x41b   :  { %v1372_v23 = vmax.f32 %v1326_v1, 0.0 }
 0x41c   :  { %v3927_v22 = vpop.f32.mrf.mxu1 }
 0x420   :  { %v1327_v57 = vpop.f32.mrf.mxu0 }
 0x421   :  { %v1328_v19 = vadd.f32 %v1327_v57, %v1238_v33  ;;  %v1248_v10 = vpop.f32.mrf.mxu3 }
 0x423   :  { %v1373_v35 = vmax.f32 %v1328_v19, 0.0 }
 0x424   :  { %v1486_v30 = vpop.f32.mrf.mxu1 }
 0x425   :  { %v1393_v36 = vpack.c.bf16 %v1373_v35, %v1372_v23 }
 0x427   :  { %1525 = vmatmul.bf16.gmra.mxu1 %v1393_v36 }
 0x428   :  { %v1330_v61 = vpop.f32.mrf.mxu0 }
 0x429   :  { %v1331_v4 = vadd.f32 %v1330_v61, %v1241_v3  ;;  %v1251_v23 = vpop.f32.mrf.mxu3 }
 0x42b   :  { %v1374_v38 = vmax.f32 %v1331_v4, 0.0 }
 0x42c   :  { %v1488_v6 = vpop.f32.mrf.mxu1 }
 0x42d   :  { %v1586_v15 = vpack.c.bf16 %v1488_v6, %v1486_v30 }
 0x430   :  { %v1332_v5 = vpop.f32.mrf.mxu0 }
 0x431   :  { %v1333_v51 = vadd.f32 %v1332_v5, %v1243_v28  ;;  %v1253_v61 = vpop.f32.mrf.mxu3 }
 0x433   :  { %v1375_v8 = vmax.f32 %v1333_v51, 0.0 }
 0x434   :  { %v1491_v14 = vpop.f32.mrf.mxu1 }
 0x435   :  { %v1394_v37 = vpack.c.bf16 %v1375_v8, %v1374_v38 }
 0x437   :  { %1530 = vmatmul.bf16.gmra.mxu1 %v1394_v37 }
 0x438   :  { %v1335_v33 = vpop.f32.mrf.mxu0 }
 0x439   :  { %v1336_v1 = vadd.f32 %v1335_v33, %v1246_v34  ;;  %v1256_v7 = vpop.f32.mrf.mxu3 }
 0x43b   :  { %v1376_v35 = vmax.f32 %v1336_v1, 0.0 }
 0x43c   :  { %v1493_v32 = vpop.f32.mrf.mxu1 }
 0x440   :  { %v1337_v57 = vpop.f32.mrf.mxu0 }
 0x441   :  { %v1338_v19 = vadd.f32 %v1337_v57, %v1248_v10  ;;  %v1258_v1 = vpop.f32.mrf.mxu3 }
 0x443   :  { %v1377_v36 = vmax.f32 %v1338_v19, 0.0 }
 0x444   :  { %v1496_v59 = vpop.f32.mrf.mxu1 }
 0x445   :  { %v1395_v30 = vpack.c.bf16 %v1377_v36, %v1376_v35 }
 0x447   :  { %1535 = vmatmul.bf16.gmra.mxu1 %v1395_v30 }
 0x448   :  { %v1340_v3 = vpop.f32.mrf.mxu0 }
 0x449   :  { %v1341_v28 = vadd.f32 %v1340_v3, %v1251_v23 }
 0x44b   :  { %v1378_v8 = vmax.f32 %v1341_v28, 0.0 }
 0x44c   :  { %v1498_v5 = vpop.f32.mrf.mxu1 }
 0x450   :  { %v1342_v51 = vpop.f32.mrf.mxu0 }
 0x451   :  { %v1343_v6 = vadd.f32 %v1342_v51, %v1253_v61  ;;  %v1588_v51 = vpack.c.bf16 %v1498_v5, %v1496_v59 }
 0x453   :  { %v1379_v38 = vmax.f32 %v1343_v6, 0.0  ;;  %v1587_v6 = vpack.c.bf16 %v1493_v32, %v1491_v14 }
 0x454   :  { %v1501_v37 = vpop.f32.mrf.mxu1 }
 0x455   :  { %v1396_v4 = vpack.c.bf16 %v1379_v38, %v1378_v8 }
 0x457   :  { %1540 = vmatmul.bf16.gmra.mxu1 %v1396_v4 }
 0x458   :  { %v1345_v34 = vpop.f32.mrf.mxu0 }
 0x459   :  { %v1346_v33 = vadd.f32 %v1345_v34, %v1256_v7  ;;  %v4709_v7 = vpack.c.bf16 %v3927_v22, %v3925_v27 }
 0x45b   :  { %v1380_v35 = vmax.f32 %v1346_v33, 0.0 }
 0x45c   :  { %v1503_v10 = vpop.f32.mrf.mxu1 }
 0x45d   :  { %v1589_v61 = vpack.c.bf16 %v1503_v10, %v1501_v37  ;;  %v4711_v37 = vpack.c.bf16 %v3915_v2, %v3913_v54 }
 0x460   :  { %v1347_v57 = vpop.f32.mrf.mxu0 }
 0x461   :  { %v1348_v19 = vadd.f32 %v1347_v57, %v1258_v1  ;;  %v4713_v1 = vld [vmem:[#allocation18_spill] sm:$0xff] }
 0x463   :  { %v1381_v36 = vmax.f32 %v1348_v19, 0.0  ;;  %v4714_v19 = vld [vmem:[#allocation9_spill] sm:$0xff] }
 0x464   :  { %v1506_v30 = vpop.f32.mrf.mxu1 }
 0x465   :  { %v1397_v42 = vpack.c.bf16 %v1381_v36, %v1380_v35  ;;  %v4715_v35 = vld [vmem:[#allocation15_spill] sm:$0xff]  ;;  %v4716_v36 = vld [vmem:[#allocation10_spill] sm:$0xff] }
 0x467   :  { %1545 = vmatmul.bf16.gmra.mxu1 %v1397_v42  ;;  %v4710_v42 = vpack.c.bf16 %v3921_v40, %v3919_v11 }
 0x46c   :  { %v1508_v23 = vpop.f32.mrf.mxu1 }
 0x46d   :  { %v1590_v3 = vpack.c.bf16 %v1508_v23, %v1506_v30  ;;  %v4717_v30 = vld [vmem:[#allocation19_spill] sm:$0xff] }
 0x46e   :  { %v4718_v23 = vld [vmem:[#allocation11_spill] sm:$0xff] }
 0x46f   :  { %1599 = vmatpush.bf16.msra.mxu2 %v1590_v3  ;;  %v4719_v3 = vld [vmem:[#allocation21_spill] sm:$0xff] }
 0x473   :  { %1600 = vmatpush.bf16.msra.mxu2 %v1589_v61  ;;  %v4720_v61 = vld [vmem:[#allocation12_spill] sm:$0xff] }
 0x474   :  { %v1511_v28 = vpop.f32.mrf.mxu1 }
 0x477   :  { %1601 = vmatpush.bf16.msra.mxu2 %v1588_v51  ;;  %v4721_v51 = vld [vmem:[#allocation23_spill] sm:$0xff] }
 0x47b   :  { %1602 = vmatpush.bf16.msra.mxu2 %v1587_v6  ;;  %v3956_v6 = vpop.permute.xlu0 %1854 }
 0x47c   :  { %v1513_v8 = vpop.f32.mrf.mxu1 }
 0x47f   :  { %1603 = vmatpush.bf16.msra.mxu2 %v1586_v15 }
 0x483   :  { %1604 = vmatpush.bf16.msra.mxu2 %v4709_v7 }
 0x484   :  { %v1516_v38 = vpop.f32.mrf.mxu1 }
 0x487   :  { %1605 = vmatpush.bf16.msra.mxu2 %v4710_v42 }
 0x48b   :  { %1606 = vmatpush.bf16.msra.mxu2 %v4711_v37 }
 0x48c   :  { %v1518_v4 = vpop.f32.mrf.mxu1 }
 0x48d   :  { %v1592_v57 = vpack.c.bf16 %v1518_v4, %v1516_v38  ;;  %v4722_v38 = vld [vmem:[#allocation13_spill] sm:$0xff]  ;;  %v3969_v4 = vpop.permute.xlu2 %1849 }
 0x48e   :  { %1607 = vmatmul.bf16.vlgmr.msra.gmra.mxu2 %v3474_v39 }
 0x494   :  { %v1521_v59 = vpop.f32.mrf.mxu1 }
 0x49c   :  { %v1523_v14 = vpop.f32.mrf.mxu1 }
 0x49e   :  { %1612 = vmatmul.bf16.gmra.mxu2 %v3484_v45  ;;  %v4712_v45 = vld [vmem:[#allocation16_spill] sm:$0xff] }
 0x4a4   :  { %v1526_v15 = vpop.f32.mrf.mxu1 }
 0x4ac   :  { %v1528_v32 = vpop.f32.mrf.mxu1 }
 0x4ae   :  { %1617 = vmatmul.bf16.gmra.mxu2 %v3490_v50 }
 0x4b4   :  { %v1531_v27 = vpop.f32.mrf.mxu1 }
 0x4bc   :  { %v1533_v22 = vpop.f32.mrf.mxu1 }
 0x4bd   :  { %v1595_v33 = vpack.c.bf16 %v1533_v22, %v1531_v27  ;;  %v3976_v27 = vpop.permute.xlu2 %1934 }
 0x4be   :  { %1622 = vmatmul.bf16.gmra.mxu2 %v3496_v56  ;;  %v1594_v56 = vpack.c.bf16 %v1528_v32, %v1526_v15 }
 0x4c4   :  { %v1536_v11 = vpop.f32.mrf.mxu1 }
 0x4cc   :  { %v1538_v40 = vpop.f32.mrf.mxu1 }
 0x4cd   :  { %v1596_v50 = vpack.c.bf16 %v1538_v40, %v1536_v11  ;;  %v4726_v40 = vld [vmem:[#allocation17_spill] sm:$0xff] }
 0x4ce   :  { %1627 = vmatmul.bf16.gmra.mxu2 %v3504_v63  ;;  %v1593_v63 = vpack.c.bf16 %v1523_v14, %v1521_v59  ;;  %v4724_v14 = vld [vmem:[#allocation14_spill] sm:$0xff] }
 0x4d4   :  { %v1541_v54 = vpop.f32.mrf.mxu1 }
 0x4dc   :  { %v1543_v2 = vpop.f32.mrf.mxu1 }
 0x4dd   :  { %v1597_v10 = vpack.c.bf16 %v1543_v2, %v1541_v54  ;;  %v4727_v2 = vld [vmem:[#allocation25_spill] sm:$0xff] }
 0x4de   :  { %1632 = vmatmul.bf16.gmra.mxu2 %v3518_v9  ;;  %v1591_v9 = vpack.c.bf16 %v1513_v8, %v1511_v28  ;;  %v3958_v28 = vpop.permute.xlu1 %1929  ;;  %v3960_v8 = vpop.permute.xlu0 %1839 }
 0x4e4   :  { %v1546_v39 = vpop.f32.mrf.mxu1 }
 0x4e6   :  { %v3962_v7 = vpop.permute.xlu1 %1844  ;;  %v3965_v42 = vpop.permute.xlu0 %1924 }
 0x4ec   :  { %v1548_v5 = vpop.f32.mrf.mxu1 }
 0x4ed   :  { %v1598_v34 = vpack.c.bf16 %v1548_v5, %v1546_v39  ;;  %v3984_v39 = vpop.permute.xlu2 %1919 }
 0x4ee   :  { %1637 = vmatmul.bf16.gmra.mxu2 %v4712_v45  ;;  %v3967_v37 = vpop.permute.xlu1 %1829  ;;  %v3971_v59 = vpop.permute.xlu0 %1909 }
 0x4ef   :  { %1688 = vmatpush.bf16.msra.mxu3 %v1598_v34  ;;  %4723 = vst [vmem:[#allocation16_spill] sm:$0xff] %v3971_v59 }
 0x4f3   :  { %1689 = vmatpush.bf16.msra.mxu3 %v1597_v10 }
 0x4f5   :  { %v3986_v10 = vpop.permute.xlu2 %1834 }
 0x4f6   :  { %v3974_v15 = vpop.permute.xlu1 %1914  ;;  %v3978_v22 = vpop.permute.xlu0 %1824 }
 0x4f7   :  { %1690 = vmatpush.bf16.msra.mxu3 %v1596_v50 }
 0x4fb   :  { %1691 = vmatpush.bf16.msra.mxu3 %v1595_v33 }
 0x4fe   :  { %1642 = vmatmul.bf16.gmra.mxu2 %v4713_v1  ;;  %v3980_v11 = vpop.permute.xlu1 %1899  ;;  %v1810_v5 = vpop.permute.xlu0 %1809 }
 0x4ff   :  { %1692 = vmatpush.bf16.msra.mxu3 %v1594_v56  ;;  %4725 = vst [vmem:[#allocation18_spill] sm:$0xff] %v3980_v11  ;;  %v4728_v56 = vld [vmem:[#allocation20_spill] sm:$0xff] }
 0x503   :  { %1693 = vmatpush.bf16.msra.mxu3 %v1593_v63  ;;  %v4729_v63 = vld [vmem:[#allocation27_spill] sm:$0xff] }
 0x506   :  { %v1815_v34 = vpop.permute.xlu1 %1814  ;;  %v3988_v50 = vpop.permute.xlu0 %1894 }
 0x507   :  { %1694 = vmatpush.bf16.msra.mxu3 %v1592_v57  ;;  %v3992_v57 = vpop.permute.xlu2 %1819 }
 0x50b   :  { %1695 = vmatpush.bf16.msra.mxu3 %v1591_v9 }
 0x50e   :  { %1696 = vmatmul.bf16.vlgmr.msra.gmra.mxu3 %v4714_v19  ;;  %1647 = vmatmul.bf16.gmra.mxu2 %v4715_v35  ;;  %v1800_v33 = vpop.permute.xlu1 %1799  ;;  %v3994_v9 = vpop.permute.xlu0 %1879 }
 0x511   :  { %v1608_v32 = vpop.f32.mrf.mxu2 }
 0x516   :  { %v3996_v35 = vpop.permute.xlu1 %1884 }
 0x519   :  { %v1610_v54 = vpop.f32.mrf.mxu2 }
 0x51e   :  { %1701 = vmatmul.bf16.gmra.mxu3 %v4716_v36  ;;  %1652 = vmatmul.bf16.gmra.mxu2 %v4717_v30  ;;  %v3998_v36 = vpop.permute.xlu2 %1904  ;;  %v4731_v30 = vld [vmem:[#allocation22_spill] sm:$0xff] }
 0x51f   :  { %4730 = vst [vmem:[#allocation9_spill] sm:$0xff] %v3998_v36 }
 0x521   :  { %v1613_v45 = vpop.f32.mrf.mxu2 }
 0x529   :  { %v1615_v1 = vpop.f32.mrf.mxu2 }
 0x52e   :  { %1706 = vmatmul.bf16.gmra.mxu3 %v4718_v23  ;;  %1657 = vmatmul.bf16.gmra.mxu2 %v4719_v3  ;;  %v4732_v3 = vld [vmem:[#allocation29_spill] sm:$0xff] }
 0x531   :  { %v1618_v19 = vpop.f32.mrf.mxu2 }
 0x539   :  { %v1620_v23 = vpop.f32.mrf.mxu2 }
 0x53e   :  { %1711 = vmatmul.bf16.gmra.mxu3 %v4720_v61  ;;  %1662 = vmatmul.bf16.gmra.mxu2 %v4721_v51  ;;  %v1795_v61 = vpop.permute.xlu0 %1794  ;;  %v4002_v51 = vpop.permute.xlu1 %1869 }
 0x546   :  { %v1780_v13 = vpop.permute.xlu0 %1779  ;;  %v1785_v31 = vpop.permute.xlu1 %1784 }
 0x54e   :  { %1716 = vmatmul.bf16.gmra.mxu3 %v4722_v38  ;;  %1667 = vmatmul.bf16.gmra.mxu2 %v4727_v2  ;;  %v4004_v2 = vpop.permute.xlu2 %1889 }
 0x55e   :  { %1721 = vmatmul.bf16.gmra.mxu3 %v4724_v14  ;;  %1672 = vmatmul.bf16.gmra.mxu2 %v4729_v63 }
 0x56e   :  { %1726 = vmatmul.bf16.gmra.mxu3 %v4726_v40  ;;  %1677 = vmatmul.bf16.gmra.mxu2 %v4732_v3  ;;  %v1623_v40 = vpop.f32.mrf.mxu2  ;;  %v4734_v3 = vld [vmem:[#allocation31_spill] sm:$0xff] }
 0x576   :  { %v1625_v29 = vpop.f32.mrf.mxu2 }
 0x57e   :  { %1731 = vmatmul.bf16.gmra.mxu3 %v4728_v56  ;;  %1682 = vmatmul.bf16.gmra.mxu2 %v4734_v3  ;;  %v1628_v21 = vpop.f32.mrf.mxu2 }
 0x58e   :  { %1736 = vmatmul.bf16.gmra.mxu3 %v4731_v30  ;;  %v4733_v30 = vld [vmem:[#allocation24_spill] sm:$0xff] }
 0x591   :  { %v1697_v38 = vpop.f32.mrf.mxu3 }
 0x592   :  { %v1698_v14 = vadd.f32 %v1697_v38, %v1608_v32  ;;  %v1805_v32 = vpop.permute.xlu2 %1804 }
 0x594   :  { %v4006_v60 = vmul.f32 %v1780_v13, %v1698_v14  ;;  %v1630_v14 = vpop.f32.mrf.mxu2 }
 0x599   :  { %v1699_v56 = vpop.f32.mrf.mxu3 }
 0x59a   :  { %v1700_v63 = vadd.f32 %v1699_v56, %v1610_v54  ;;  %v1790_v56 = vpop.permute.xlu2 %1789 }
 0x59c   :  { %v4008_v20 = vmul.f32 %v1785_v31, %v1700_v63  ;;  %v4735_v31 = vld [vmem:[#allocation26_spill] sm:$0xff]  ;;  %v1633_v47 = vpop.f32.mrf.mxu2 }
 0x59e   :  { %1741 = vmatmul.bf16.gmra.mxu3 %v4733_v30 }
 0x5a1   :  { %v1702_v38 = vpop.f32.mrf.mxu3 }
 0x5a2   :  { %v1703_v52 = vadd.f32 %v1702_v38, %v1613_v45  ;;  %v1875_v43 = vpop.permute.xlu2 %1874 }
 0x5a4   :  { %v4014_v17 = vmul.f32 %v1790_v56, %v1703_v52 }
 0x5a9   :  { %v1704_v58 = vpop.f32.mrf.mxu3 }
 0x5aa   :  { %v1705_v54 = vadd.f32 %v1704_v58, %v1615_v1  ;;  %v4736_v58 = vld [vmem:[#allocation28_spill] sm:$0xff] }
 0x5ac   :  { %v4016_v13 = vmul.f32 %v1795_v61, %v1705_v54  ;;  %v1635_v61 = vpop.f32.mrf.mxu2 }
 0x5ae   :  { %1746 = vmatmul.bf16.gmra.mxu3 %v4735_v31 }
 0x5b1   :  { %v1707_v30 = vpop.f32.mrf.mxu3 }
 0x5b2   :  { %v1708_v3 = vadd.f32 %v1707_v30, %v1618_v19  ;;  %v4737_v30 = vld [vmem:[#allocation30_spill] sm:$0xff] }
 0x5b4   :  { %v4021_v45 = vmul.f32 %v1800_v33, %v1708_v3  ;;  %v1638_v63 = vpop.f32.mrf.mxu2  ;;  %v4738_v3 = vld [vmem:[#allocation32_spill] sm:$0xff] }
 0x5b9   :  { %v1709_v26 = vpop.f32.mrf.mxu3 }
 0x5ba   :  { %v1710_v24 = vadd.f32 %v1709_v26, %v1620_v23 }
 0x5bc   :  { %v4023_v38 = vmul.f32 %v1805_v32, %v1710_v24  ;;  %v1640_v24 = vpop.f32.mrf.mxu2 }
 0x5be   :  { %1751 = vmatmul.bf16.gmra.mxu3 %v4736_v58 }
 0x5c1   :  { %v1712_v1 = vpop.f32.mrf.mxu3 }
 0x5c2   :  { %v1713_v54 = vadd.f32 %v1712_v1, %v1623_v40 }
 0x5c4   :  { %v1943_v18 = vmul.f32 %v1810_v5, %v1713_v54  ;;  %v1643_v58 = vpop.f32.mrf.mxu2 }
 0x5c9   :  { %v1714_v56 = vpop.f32.mrf.mxu3 }
 0x5ca   :  { %v1715_v31 = vadd.f32 %v1714_v56, %v1625_v29 }
 0x5cc   :  { %v1944_v19 = vmul.f32 %v1815_v34, %v1715_v31  ;;  %v1645_v46 = vpop.f32.mrf.mxu2  ;;  %v4740_v34 = vld [vmem:[#allocation34_spill] sm:$0xff] }
 0x5ce   :  { %1756 = vmatmul.bf16.gmra.mxu3 %v4737_v30  ;;  %v1972_v26 = vpack.c.bf16 %v1944_v19, %v1943_v18 }
 0x5d1   :  { %v1717_v33 = vpop.f32.mrf.mxu3 }
 0x5d2   :  { %v1718_v23 = vadd.f32 %v1717_v33, %v1628_v21 }
 0x5d4   :  { %v1648_v29 = vpop.f32.mrf.mxu2 }
 0x5d9   :  { %v1719_v32 = vpop.f32.mrf.mxu3 }
 0x5dc   :  { %v1650_v5 = vpop.f32.mrf.mxu2 }
 0x5de   :  { %1761 = vmatmul.bf16.gmra.mxu3 %v4738_v3 }
 0x5e1   :  { %v1722_v25 = vpop.f32.mrf.mxu3 }
 0x5e2   :  { %v1723_v11 = vadd.f32 %v1722_v25, %v1633_v47  ;;  %v1865_v47 = vpop.permute.xlu0 %1864 }
 0x5e4   :  { %v1653_v18 = vpop.f32.mrf.mxu2 }
 0x5e9   :  { %v1724_v52 = vpop.f32.mrf.mxu3 }
 0x5ea   :  { %v1725_v0 = vadd.f32 %v1724_v52, %v1635_v61  ;;  %v1860_v61 = vpop.permute.xlu2 %1859 }
 0x5ec   :  { %v1655_v59 = vpop.f32.mrf.mxu2 }
 0x5ee   :  { %1766 = vmatmul.bf16.gmra.mxu3 %v4739_v12 }
 0x5f1   :  { %v1727_v40 = vpop.f32.mrf.mxu3 }
 0x5f2   :  { %v1728_v30 = vadd.f32 %v1727_v40, %v1638_v63 }
 0x5f4   :  { %v1949_v36 = vmul.f32 %v3960_v8, %v1728_v30  ;;  %v1658_v40 = vpop.f32.mrf.mxu2 }
 0x5f9   :  { %v1729_v1 = vpop.f32.mrf.mxu3 }
 0x5fa   :  { %v1730_v31 = vadd.f32 %v1729_v1, %v1640_v24  ;;  %v1948_v24 = vmul.f32 %v3986_v10, %v1725_v0  ;;  %v4741_v10 = vpack.c.bf16 %v4023_v38, %v4021_v45 }
 0x5fc   :  { %v1950_v12 = vmul.f32 %v3962_v7, %v1730_v31  ;;  %v1945_v7 = vmul.f32 %v3992_v57, %v1718_v23  ;;  %v1660_v57 = vpop.f32.mrf.mxu2 }
 0x5fe   :  { %1771 = vmatmul.bf16.gmra.mxu3 %v4740_v34  ;;  %v1975_v63 = vpack.c.bf16 %v1950_v12, %v1949_v36  ;;  %v4742_v36 = vpack.c.bf16 %v4016_v13, %v4014_v17 }
 0x601   :  { %v1732_v54 = vpop.f32.mrf.mxu3 }
 0x602   :  { %v1733_v56 = vadd.f32 %v1732_v54, %v1643_v58  ;;  %v1720_v58 = vadd.f32 %v1719_v32, %v1630_v14 }
 0x604   :  { %v1951_v33 = vmul.f32 %v3969_v4, %v1733_v56  ;;  %v1947_v4 = vmul.f32 %v3967_v37, %v1723_v11  ;;  %v1663_v38 = vpop.f32.mrf.mxu2 }
 0x606   :  { %v1974_v52 = vpack.c.bf16 %v1948_v24, %v1947_v4 }
 0x609   :  { %v1734_v21 = vpop.f32.mrf.mxu3 }
 0x60a   :  { %v1735_v19 = vadd.f32 %v1734_v21, %v1645_v46 }
 0x60c   :  { %v1952_v3 = vmul.f32 %v3956_v6, %v1735_v19  ;;  %v1946_v6 = vmul.f32 %v3978_v22, %v1720_v58  ;;  %v1665_v54 = vpop.f32.mrf.mxu2 }
 0x60e   :  { %v1976_v48 = vpack.c.bf16 %v1952_v3, %v1951_v33 }
 0x610   :  { %1985 = vmatpush.bf16.msra.mxu0 %v1976_v48  ;;  %v1973_v48 = vpack.c.bf16 %v1946_v6, %v1945_v7 }
 0x611   :  { %v1737_v34 = vpop.f32.mrf.mxu3 }
 0x612   :  { %v1738_v46 = vadd.f32 %v1737_v34, %v1648_v29 }
 0x614   :  { %1986 = vmatpush.bf16.msra.mxu0 %v1975_v63  ;;  %v4040_v14 = vmul.f32 %v1860_v61, %v1738_v46  ;;  %v1668_v56 = vpop.f32.mrf.mxu2 }
 0x618   :  { %1987 = vmatpush.bf16.msra.mxu0 %v1974_v52 }
 0x619   :  { %v1739_v25 = vpop.f32.mrf.mxu3 }
 0x61a   :  { %v1740_v8 = vadd.f32 %v1739_v25, %v1650_v5 }
 0x61c   :  { %v4042_v0 = vmul.f32 %v1865_v47, %v1740_v8  ;;  %1988 = vmatpush.bf16.msra.mxu0 %v1973_v48  ;;  %v1670_v30 = vpop.f32.mrf.mxu2 }
 0x61e   :  { %v1977_v37 = vpack.c.bf16 %v4042_v0, %v4040_v14  ;;  %v4757_v14 = vld [vmem:[#allocation41_spill] sm:$0xff] }
 0x620   :  { %1989 = vmatpush.bf16.msra.mxu0 %v1972_v26  ;;  %v4743_v26 = vpack.c.bf16 %v4008_v20, %v4006_v60 }
 0x621   :  { %v1742_v22 = vpop.f32.mrf.mxu3 }
 0x622   :  { %v1743_v11 = vadd.f32 %v1742_v22, %v1653_v18 }
 0x624   :  { %1990 = vmatpush.bf16.msra.mxu0 %v4741_v10  ;;  %v4053_v29 = vmul.f32 %v4002_v51, %v1743_v11  ;;  %v1673_v12 = vpop.f32.mrf.mxu2 }
 0x628   :  { %1991 = vmatpush.bf16.msra.mxu0 %v4742_v36 }
 0x629   :  { %v1744_v23 = vpop.f32.mrf.mxu3 }
 0x62a   :  { %v1745_v32 = vadd.f32 %v1744_v23, %v1655_v59 }
 0x62c   :  { %v4055_v1 = vmul.f32 %v1875_v43, %v1745_v32  ;;  %1992 = vmatpush.bf16.msra.mxu0 %v4743_v26  ;;  %v4746_v32 = vld [vmem:[#allocation18_spill] sm:$0xff] }
 0x62e   :  { %v1978_v45 = vpack.c.bf16 %v4055_v1, %v4053_v29  ;;  %v4755_v29 = vld [vmem:[#allocation48_spill] sm:$0xff]  ;;  %v4756_v1 = vld [vmem:[#allocation39_spill] sm:$0xff] }
 0x62f   :  { %1993 = vmatmul.bf16.vlgmr.msra.gmra.mxu0 %v3775_v49 }
 0x631   :  { %v1747_v5 = vpop.f32.mrf.mxu3 }
 0x632   :  { %v1748_v17 = vadd.f32 %v1747_v5, %v1658_v40  ;;  %v4751_v5 = vld [vmem:[#allocation44_spill] sm:$0xff] }
 0x634   :  { %v1957_v51 = vmul.f32 %v3994_v9, %v1748_v17  ;;  %v4752_v17 = vld [vmem:[#allocation37_spill] sm:$0xff] }
 0x639   :  { %v1749_v13 = vpop.f32.mrf.mxu3 }
 0x63a   :  { %v1750_v59 = vadd.f32 %v1749_v13, %v1660_v57  ;;  %v4744_v57 = vld [vmem:[#allocation16_spill] sm:$0xff]  ;;  %v4753_v13 = vld [vmem:[#allocation46_spill] sm:$0xff] }
 0x63c   :  { %v1958_v43 = vmul.f32 %v3996_v35, %v1750_v59  ;;  %v4759_v59 = vld [vmem:[#allocation43_spill] sm:$0xff] }
 0x63e   :  { %v1979_v18 = vpack.c.bf16 %v1958_v43, %v1957_v51 }
 0x63f   :  { %1998 = vmatmul.bf16.gmra.mxu0 %v3781_v55  ;;  %v1675_v55 = vpop.f32.mrf.mxu2 }
 0x641   :  { %v1752_v60 = vpop.f32.mrf.mxu3 }
 0x642   :  { %v1753_v20 = vadd.f32 %v1752_v60, %v1663_v38  ;;  %v4750_v38 = vld [vmem:[#allocation36_spill] sm:$0xff]  ;;  %v4761_v60 = vld [vmem:[#allocation45_spill] sm:$0xff] }
 0x644   :  { %v1959_v19 = vmul.f32 %v4004_v2, %v1753_v20  ;;  %v2163_v20 = vlaneseq }
 0x647   :  { %v1678_v24 = vpop.f32.mrf.mxu2 }
 0x649   :  { %v1754_v21 = vpop.f32.mrf.mxu3 }
 0x64a   :  { %v1755_v31 = vadd.f32 %v1754_v21, %v1665_v54  ;;  %v4754_v54 = vld [vmem:[#allocation38_spill] sm:$0xff]  ;;  %v4102_v21 = vand.u32 127, %v2163_v20 }
 0x64c   :  { %v1960_v49 = vmul.f32 %v3988_v50, %v1755_v31  ;;  %vm2165_vm0 = vcmp.lt.s32.totalorder %v4102_v21, 8 }
 0x64e   :  { %v1980_v33 = vpack.c.bf16 %v1960_v49, %v1959_v19  ;;  %v4762_v49 = vld [vmem:[#allocation54_spill] sm:$0xff] }
 0x64f   :  { %2003 = vmatmul.bf16.gmra.mxu0 %v3793_v41  ;;  %v1680_v2 = vpop.f32.mrf.mxu2 }
 0x651   :  { %v1757_v3 = vpop.f32.mrf.mxu3 }
 0x652   :  { %v1758_v9 = vadd.f32 %v1757_v3, %v1668_v56 }
 0x654   :  { %v1961_v26 = vmul.f32 %v4746_v32, %v1758_v9 }
 0x657   :  { %v1683_v50 = vpop.f32.mrf.mxu2 }
 0x659   :  { %v1759_v35 = vpop.f32.mrf.mxu3 }
 0x65a   :  { %v1760_v22 = vadd.f32 %v1759_v35, %v1670_v30 }
 0x65f   :  { %2008 = vmatmul.bf16.gmra.mxu0 %v3805_v53  ;;  %v1685_v6 = vpop.f32.mrf.mxu2 }
 0x661   :  { %v1762_v34 = vpop.f32.mrf.mxu3 }
 0x662   :  { %v1763_v40 = vadd.f32 %v1762_v34, %v1673_v12 }
 0x664   :  { %v1963_v36 = vmul.f32 %v4744_v57, %v1763_v40 }
 0x669   :  { %v1764_v58 = vpop.f32.mrf.mxu3 }
 0x66a   :  { %v1765_v48 = vadd.f32 %v1764_v58, %v1675_v55 }
 0x66c   :  { %v1964_v11 = vmul.f32 %v3974_v15, %v1765_v48  ;;  %v4748_v15 = vld [vmem:[#allocation35_spill] sm:$0xff] }
 0x66f   :  { %2013 = vmatmul.bf16.gmra.mxu0 %v3811_v62 }
 0x671   :  { %v1767_v46 = vpop.f32.mrf.mxu3 }
 0x672   :  { %v1768_v47 = vadd.f32 %v1767_v46, %v1678_v24  ;;  %v4764_v24 = vld [vmem:[#allocation56_spill] sm:$0xff] }
 0x679   :  { %v1769_v63 = vpop.f32.mrf.mxu3 }
 0x67a   :  { %v1770_v7 = vadd.f32 %v1769_v63, %v1680_v2  ;;  %v4765_v2 = vld [vmem:[#allocation49_spill] sm:$0xff] }
 0x67c   :  { %v1966_v62 = vmul.f32 %v3965_v42, %v1770_v7 }
 0x67f   :  { %2018 = vmatmul.bf16.gmra.mxu0 %v3817_v44  ;;  %v1965_v44 = vmul.f32 %v3984_v39, %v1768_v47  ;;  %v4749_v39 = vld [vmem:[#allocation42_spill] sm:$0xff]  ;;  %v4766_v47 = vld [vmem:[#allocation51_spill] sm:$0xff] }
 0x681   :  { %v1772_v4 = vpop.f32.mrf.mxu3  ;;  %v1983_v10 = vpack.c.bf16 %v1966_v62, %v1965_v44 }
 0x682   :  { %v1773_v41 = vadd.f32 %v1772_v4, %v1683_v50 }
 0x684   :  { %v1967_v53 = vmul.f32 %v3958_v28, %v1773_v41  ;;  %v4745_v28 = vld [vmem:[#allocation9_spill] sm:$0xff] }
 0x685   :  { %v1962_v23 = vmul.f32 %v4745_v28, %v1760_v22 }
 0x687   :  { %v1981_v42 = vpack.c.bf16 %v1962_v23, %v1961_v26  ;;  %v4768_v26 = vld [vmem:[#allocation55_spill] sm:$0xff] }
 0x689   :  { %v1774_v52 = vpop.f32.mrf.mxu3 }
 0x68a   :  { %v1775_v25 = vadd.f32 %v1774_v52, %v1685_v6 }
 0x68c   :  { %v1968_v8 = vmul.f32 %v3976_v27, %v1775_v25  ;;  %v1982_v27 = vpack.c.bf16 %v1964_v11, %v1963_v36  ;;  %v4767_v11 = vld [vmem:[#allocation53_spill] sm:$0xff] }
 0x68e   :  { %v1984_v61 = vpack.c.bf16 %v1968_v8, %v1967_v53 }
 0x68f   :  { %2023 = vmatmul.bf16.gmra.mxu0 %v3823_v16  ;;  %v4747_v16 = vld [vmem:[#allocation40_spill] sm:$0xff] }
 0x690   :  { %2074 = vmatpush.bf16.msra.mxu1 %v1984_v61 }
 0x694   :  { %2075 = vmatpush.bf16.msra.mxu1 %v1983_v10 }
 0x698   :  { %2076 = vmatpush.bf16.msra.mxu1 %v1982_v27 }
 0x69c   :  { %2077 = vmatpush.bf16.msra.mxu1 %v1981_v42 }
 0x69f   :  { %2028 = vmatmul.bf16.gmra.mxu0 %v4747_v16 }
 0x6a0   :  { %2078 = vmatpush.bf16.msra.mxu1 %v1980_v33  ;;  %v4763_v33 = vld [vmem:[#allocation47_spill] sm:$0xff] }
 0x6a4   :  { %2079 = vmatpush.bf16.msra.mxu1 %v1979_v18  ;;  %v4760_v18 = vld [vmem:[#allocation52_spill] sm:$0xff] }
 0x6a8   :  { %2080 = vmatpush.bf16.msra.mxu1 %v1978_v45  ;;  %v4758_v45 = vld [vmem:[#allocation50_spill] sm:$0xff] }
 0x6ac   :  { %2081 = vmatpush.bf16.msra.mxu1 %v1977_v37  ;;  %v1994_v0 = vpop.f32.mrf.mxu0 }
 0x6af   :  { %2082 = vmatmul.bf16.vlgmr.msra.gmra.mxu1 %v4748_v15  ;;  %2033 = vmatmul.bf16.gmra.mxu0 %v4749_v39 }
 0x6b4   :  { %v1996_v37 = vpop.f32.mrf.mxu0 }
 0x6bc   :  { %v1999_v51 = vpop.f32.mrf.mxu0 }
 0x6bf   :  { %2087 = vmatmul.bf16.gmra.mxu1 %v4750_v38  ;;  %2038 = vmatmul.bf16.gmra.mxu0 %v4751_v5 }
 0x6c4   :  { %v2001_v43 = vpop.f32.mrf.mxu0 }
 0x6cc   :  { %v2004_v56 = vpop.f32.mrf.mxu0 }
 0x6cf   :  { %2092 = vmatmul.bf16.gmra.mxu1 %v4752_v17  ;;  %2043 = vmatmul.bf16.gmra.mxu0 %v4753_v13 }
 0x6d4   :  { %v2006_v19 = vpop.f32.mrf.mxu0 }
 0x6dc   :  { %v2009_v12 = vpop.f32.mrf.mxu0 }
 0x6df   :  { %2097 = vmatmul.bf16.gmra.mxu1 %v4754_v54  ;;  %2048 = vmatmul.bf16.gmra.mxu0 %v4755_v29  ;;  %v4769_v54 = vld [vmem:[#allocation57_spill] sm:$0xff] }
 0x6e4   :  { %v2011_v58 = vpop.f32.mrf.mxu0 }
 0x6ec   :  { %v2014_v4 = vpop.f32.mrf.mxu0 }
 0x6ef   :  { %2102 = vmatmul.bf16.gmra.mxu1 %v4756_v1  ;;  %2053 = vmatmul.bf16.gmra.mxu0 %v4758_v45 }
 0x6f4   :  { %v2016_v7 = vpop.f32.mrf.mxu0 }
 0x6fc   :  { %v2019_v48 = vpop.f32.mrf.mxu0 }
 0x6ff   :  { %2107 = vmatmul.bf16.gmra.mxu1 %v4757_v14  ;;  %2058 = vmatmul.bf16.gmra.mxu0 %v4760_v18 }
 0x704   :  { %v2021_v44 = vpop.f32.mrf.mxu0 }
 0x70c   :  { %v2024_v28 = vpop.f32.mrf.mxu0 }
 0x70f   :  { %2112 = vmatmul.bf16.gmra.mxu1 %v4759_v59  ;;  %2063 = vmatmul.bf16.gmra.mxu0 %v4762_v49 }
 0x714   :  { %v2026_v16 = vpop.f32.mrf.mxu0 }
 0x71c   :  { %v2029_v5 = vpop.f32.mrf.mxu0 }
 0x71f   :  { %2117 = vmatmul.bf16.gmra.mxu1 %v4761_v60  ;;  %2068 = vmatmul.bf16.gmra.mxu0 %v4764_v24 }
 0x724   :  { %v2031_v14 = vpop.f32.mrf.mxu0 }
 0x72c   :  { %v2083_v31 = vpop.f32.mrf.mxu1 }
 0x72d   :  { %v2084_v30 = vadd.f32 %v2083_v31, %v1994_v0 }
 0x72f   :  { %2122 = vmatmul.bf16.gmra.mxu1 %v4763_v33  ;;  %v4109_v3 = vsel %vm2165_vm0, %v2084_v30, -1e+30  ;;  %v4771_v30 = vld [vmem:[#allocation59_spill] sm:$0xff] }
 0x730   :  { %2198 = vmax.xlane.f32.xlu1 %v4109_v3 }
 0x734   :  { %v2085_v9 = vpop.f32.mrf.mxu1 }
 0x735   :  { %v2086_v35 = vadd.f32 %v2085_v9, %v1996_v37 }
 0x737   :  { %v4114_v55 = vsel %vm2165_vm0, %v2086_v35, -1e+30 }
 0x738   :  { %2200 = vmax.xlane.f32.xlu2 %v4114_v55 }
 0x73c   :  { %v2088_v34 = vpop.f32.mrf.mxu1 }
 0x73d   :  { %v2089_v46 = vadd.f32 %v2088_v34, %v1999_v51  ;;  %v2034_v51 = vpop.f32.mrf.mxu0 }
 0x73f   :  { %2127 = vmatmul.bf16.gmra.mxu1 %v4765_v2  ;;  %v4121_v63 = vsel %vm2165_vm0, %v2089_v46, -1e+30 }
 0x740   :  { %2202 = vmax.xlane.f32.xlu0 %v4121_v63 }
 0x744   :  { %v2090_v50 = vpop.f32.mrf.mxu1 }
 0x745   :  { %v2091_v41 = vadd.f32 %v2090_v50, %v2001_v43  ;;  %v4770_v43 = vld [vmem:[#allocation58_spill] sm:$0xff]  ;;  %v2036_v31 = vpop.f32.mrf.mxu0 }
 0x747   :  { %v4126_v6 = vsel %vm2165_vm0, %v2091_v41, -1e+30 }
 0x748   :  { %2204 = vmax.xlane.f32.xlu2 %v4126_v6 }
 0x74c   :  { %v2093_v52 = vpop.f32.mrf.mxu1 }
 0x74d   :  { %v2094_v25 = vadd.f32 %v2093_v52, %v2004_v56  ;;  %v2039_v9 = vpop.f32.mrf.mxu0 }
 0x74f   :  { %2132 = vmatmul.bf16.gmra.mxu1 %v4766_v47  ;;  %v4132_v53 = vsel %vm2165_vm0, %v2094_v25, -1e+30 }
 0x750   :  { %2206 = vmax.xlane.f32.xlu1 %v4132_v53 }
 0x754   :  { %v2095_v8 = vpop.f32.mrf.mxu1 }
 0x755   :  { %v2096_v62 = vadd.f32 %v2095_v8, %v2006_v19  ;;  %v2041_v41 = vpop.f32.mrf.mxu0 }
 0x757   :  { %v4137_v61 = vsel %vm2165_vm0, %v2096_v62, -1e+30 }
 0x758   :  { %2208 = vmax.xlane.f32.xlu2 %v4137_v61 }
 0x75c   :  { %v2098_v40 = vpop.f32.mrf.mxu1 }
 0x75d   :  { %v2099_v22 = vadd.f32 %v2098_v40, %v2009_v12 }
 0x75f   :  { %2137 = vmatmul.bf16.gmra.mxu1 %v4767_v11  ;;  %v4143_v10 = vsel %vm2165_vm0, %v2099_v22, -1e+30  ;;  %v2044_v22 = vpop.f32.mrf.mxu0 }
 0x760   :  { %2210 = vmax.xlane.f32.xlu0 %v4143_v10 }
 0x764   :  { %v2100_v57 = vpop.f32.mrf.mxu1 }
 0x765   :  { %v2101_v36 = vadd.f32 %v2100_v57, %v2011_v58 }
 0x767   :  { %v4148_v23 = vsel %vm2165_vm0, %v2101_v36, -1e+30 }
 0x768   :  { %2212 = vmax.xlane.f32.xlu1 %v4148_v23 }
 0x76c   :  { %v2103_v27 = vpop.f32.mrf.mxu1 }
 0x76d   :  { %v2104_v32 = vadd.f32 %v2103_v27, %v2014_v4 }
 0x76f   :  { %2142 = vmatmul.bf16.gmra.mxu1 %v4768_v26  ;;  %v4154_v42 = vsel %vm2165_vm0, %v2104_v32, -1e+30 }
 0x770   :  { %2214 = vmax.xlane.f32.xlu2 %v4154_v42 }
 0x774   :  { %v2105_v15 = vpop.f32.mrf.mxu1 }
 0x775   :  { %v2106_v39 = vadd.f32 %v2105_v15, %v2016_v7 }
 0x777   :  { %v4159_v38 = vsel %vm2165_vm0, %v2106_v39, -1e+30  ;;  %v2046_v39 = vpop.f32.mrf.mxu0 }
 0x778   :  { %2216 = vmax.xlane.f32.xlu0 %v4159_v38 }
 0x77c   :  { %v2108_v17 = vpop.f32.mrf.mxu1 }
 0x77d   :  { %v2109_v13 = vadd.f32 %v2108_v17, %v2019_v48 }
 0x77f   :  { %2147 = vmatmul.bf16.gmra.mxu1 %v4769_v54  ;;  %v4165_v29 = vsel %vm2165_vm0, %v2109_v13, -1e+30 }
 0x780   :  { %2218 = vmax.xlane.f32.xlu1 %v4165_v29 }
 0x784   :  { %v2110_v1 = vpop.f32.mrf.mxu1 }
 0x785   :  { %v2111_v0 = vadd.f32 %v2110_v1, %v2021_v44 }
 0x787   :  { %v4170_v37 = vsel %vm2165_vm0, %v2111_v0, -1e+30 }
 0x788   :  { %2220 = vmax.xlane.f32.xlu2 %v4170_v37 }
 0x78c   :  { %v2113_v45 = vpop.f32.mrf.mxu1 }
 0x78d   :  { %v2114_v59 = vadd.f32 %v2113_v45, %v2024_v28  ;;  %v2049_v45 = vpop.f32.mrf.mxu0 }
 0x78f   :  { %2152 = vmatmul.bf16.gmra.mxu1 %v4770_v43  ;;  %v4176_v18 = vsel %vm2165_vm0, %v2114_v59, -1e+30 }
 0x790   :  { %2222 = vmax.xlane.f32.xlu0 %v4176_v18 }
 0x794   :  { %v2115_v60 = vpop.f32.mrf.mxu1 }
 0x795   :  { %v2116_v20 = vadd.f32 %v2115_v60, %v2026_v16 }
 0x797   :  { %v4181_v56 = vsel %vm2165_vm0, %v2116_v20, -1e+30 }
 0x798   :  { %2224 = vmax.xlane.f32.xlu1 %v4181_v56 }
 0x79c   :  { %v2118_v19 = vpop.f32.mrf.mxu1 }
 0x79d   :  { %v2119_v49 = vadd.f32 %v2118_v19, %v2029_v5 }
 0x79f   :  { %2157 = vmatmul.bf16.gmra.mxu1 %v4771_v30  ;;  %v4187_v33 = vsel %vm2165_vm0, %v2119_v49, -1e+30 }
 0x7a0   :  { %2226 = vmax.xlane.f32.xlu2 %v4187_v33 }
 0x7a3   :  { %v2199_v12 = vpop.xlane.xlu1 %2198 }
 0x7a4   :  { %v4191_v35 = vsub.f32 %v4109_v3, %v2199_v12  ;;  %v2120_v34 = vpop.f32.mrf.mxu1 }
 0x7a5   :  { %v2121_v58 = vadd.f32 %v2120_v34, %v2031_v14 }
 0x7a6   :  { %v2294_v24 = vmul.f32 1.442695, %v4191_v35 }
 0x7a7   :  { %v4196_v46 = vsel %vm2165_vm0, %v2121_v58, -1e+30 }
 0x7a8   :  { %3093 = vpow2.f32 %v2294_v24  ;;  %2228 = vmax.xlane.f32.xlu0 %v4196_v46 }
 0x7ab   :  { %v2201_v2 = vpop.xlane.xlu2 %2200 }
 0x7ac   :  { %v4200_v50 = vsub.f32 %v4114_v55, %v2201_v2  ;;  %v2123_v4 = vpop.f32.mrf.mxu1 }
 0x7ad   :  { %v2124_v52 = vadd.f32 %v2123_v4, %v2034_v51 }
 0x7ae   :  { %v3094_v3 = vpop.eup %3093  ;;  %v2296_v7 = vmul.f32 1.442695, %v4200_v50 }
 0x7af   :  { %v2358_v25 = vsel %vm2165_vm0, %v3094_v3, 0.0  ;;  %v4207_v47 = vsel %vm2165_vm0, %v2124_v52, -1e+30 }
 0x7b0   :  { %3095 = vpow2.f32 %v2296_v7  ;;  %2390 = vadd.xlane.f32.xlu2 %v2358_v25  ;;  %2230 = vmax.xlane.f32.xlu1 %v4207_v47 }
 0x7b3   :  { %v2203_v8 = vpop.xlane.xlu0 %2202 }
 0x7b4   :  { %v4211_v55 = vsub.f32 %v4121_v63, %v2203_v8  ;;  %v2125_v48 = vpop.f32.mrf.mxu1 }
 0x7b5   :  { %v2126_v62 = vadd.f32 %v2125_v48, %v2036_v31 }
 0x7b6   :  { %v3096_v40 = vpop.eup %3095  ;;  %v2298_v44 = vmul.f32 1.442695, %v4211_v55 }
 0x7b7   :  { %v2359_v11 = vsel %vm2165_vm0, %v3096_v40, 0.0  ;;  %v4218_v57 = vsel %vm2165_vm0, %v2126_v62, -1e+30 }
 0x7b8   :  { %3097 = vpow2.f32 %v2298_v44  ;;  %2392 = vadd.xlane.f32.xlu0 %v2359_v11  ;;  %2232 = vmax.xlane.f32.xlu2 %v4218_v57 }
 0x7bb   :  { %v2205_v36 = vpop.xlane.xlu2 %2204 }
 0x7bc   :  { %v4222_v63 = vsub.f32 %v4126_v6, %v2205_v36  ;;  %v2128_v28 = vpop.f32.mrf.mxu1 }
 0x7bd   :  { %v2129_v27 = vadd.f32 %v2128_v28, %v2039_v9  ;;  %v2051_v9 = vpop.f32.mrf.mxu0 }
 0x7be   :  { %v3098_v32 = vpop.eup %3097  ;;  %v2300_v26 = vmul.f32 1.442695, %v4222_v63 }
 0x7bf   :  { %v2360_v16 = vsel %vm2165_vm0, %v3098_v32, 0.0  ;;  %v4229_v15 = vsel %vm2165_vm0, %v2129_v27, -1e+30 }
 0x7c0   :  { %3099 = vpow2.f32 %v2300_v26  ;;  %2394 = vadd.xlane.f32.xlu1 %v2360_v16  ;;  %2234 = vmax.xlane.f32.xlu0 %v4229_v15 }
 0x7c3   :  { %v2207_v5 = vpop.xlane.xlu1 %2206 }
 0x7c4   :  { %v4233_v6 = vsub.f32 %v4132_v53, %v2207_v5  ;;  %v2130_v17 = vpop.f32.mrf.mxu1 }
 0x7c5   :  { %v2131_v13 = vadd.f32 %v2130_v17, %v2041_v41  ;;  %v2054_v25 = vpop.f32.mrf.mxu0 }
 0x7c6   :  { %v3100_v54 = vpop.eup %3099  ;;  %v2302_v1 = vmul.f32 1.442695, %v4233_v6 }
 0x7c7   :  { %v2361_v14 = vsel %vm2165_vm0, %v3100_v54, 0.0  ;;  %v4240_v0 = vsel %vm2165_vm0, %v2131_v13, -1e+30 }
 0x7c8   :  { %3101 = vpow2.f32 %v2302_v1  ;;  %2396 = vadd.xlane.f32.xlu2 %v2361_v14  ;;  %2236 = vmax.xlane.f32.xlu1 %v4240_v0 }
 0x7cb   :  { %v2209_v59 = vpop.xlane.xlu2 %2208 }
 0x7cc   :  { %v4244_v53 = vsub.f32 %v4137_v61, %v2209_v59  ;;  %v2133_v51 = vpop.f32.mrf.mxu1 }
 0x7cd   :  { %v2134_v43 = vadd.f32 %v2133_v51, %v2044_v22  ;;  %v2056_v27 = vpop.f32.mrf.mxu0 }
 0x7ce   :  { %v3102_v60 = vpop.eup %3101  ;;  %v2304_v20 = vmul.f32 1.442695, %v4244_v53 }
 0x7cf   :  { %v2362_v31 = vsel %vm2165_vm0, %v3102_v60, 0.0  ;;  %v4251_v19 = vsel %vm2165_vm0, %v2134_v43, -1e+30 }
 0x7d0   :  { %3103 = vpow2.f32 %v2304_v20  ;;  %2398 = vadd.xlane.f32.xlu0 %v2362_v31  ;;  %2238 = vmax.xlane.f32.xlu2 %v4251_v19 }
 0x7d3   :  { %v2211_v49 = vpop.xlane.xlu0 %2210 }
 0x7d4   :  { %v4255_v61 = vsub.f32 %v4143_v10, %v2211_v49  ;;  %v2135_v30 = vpop.f32.mrf.mxu1 }
 0x7d5   :  { %v2136_v12 = vadd.f32 %v2135_v30, %v2046_v39  ;;  %v2059_v54 = vpop.f32.mrf.mxu0 }
 0x7d6   :  { %v3104_v34 = vpop.eup %3103  ;;  %v2306_v58 = vmul.f32 1.442695, %v4255_v61 }
 0x7d7   :  { %v2363_v24 = vsel %vm2165_vm0, %v3104_v34, 0.0  ;;  %v4262_v2 = vsel %vm2165_vm0, %v2136_v12, -1e+30 }
 0x7d8   :  { %3105 = vpow2.f32 %v2306_v58  ;;  %2400 = vadd.xlane.f32.xlu1 %v2363_v24  ;;  %2240 = vmax.xlane.f32.xlu0 %v4262_v2 }
 0x7db   :  { %v2213_v4 = vpop.xlane.xlu1 %2212 }
 0x7dc   :  { %v4266_v10 = vsub.f32 %v4148_v23, %v2213_v4  ;;  %v2138_v41 = vpop.f32.mrf.mxu1 }
 0x7dd   :  { %v2139_v52 = vadd.f32 %v2138_v41, %v2049_v45  ;;  %v2061_v31 = vpop.f32.mrf.mxu0 }
 0x7de   :  { %v3106_v3 = vpop.eup %3105  ;;  %v2308_v7 = vmul.f32 1.442695, %v4266_v10 }
 0x7df   :  { %v2364_v8 = vsel %vm2165_vm0, %v3106_v3, 0.0  ;;  %v4273_v48 = vsel %vm2165_vm0, %v2139_v52, -1e+30 }
 0x7e0   :  { %3107 = vpow2.f32 %v2308_v7  ;;  %2402 = vadd.xlane.f32.xlu2 %v2364_v8  ;;  %2242 = vmax.xlane.f32.xlu1 %v4273_v48 }
 0x7e3   :  { %v2215_v62 = vpop.xlane.xlu2 %2214 }
 0x7e4   :  { %v4277_v23 = vsub.f32 %v4154_v42, %v2215_v62  ;;  %v2140_v40 = vpop.f32.mrf.mxu1 }
 0x7e5   :  { %v2141_v44 = vadd.f32 %v2140_v40, %v2051_v9  ;;  %v2064_v58 = vpop.f32.mrf.mxu0 }
 0x7e6   :  { %v3108_v22 = vpop.eup %3107  ;;  %v2310_v11 = vmul.f32 1.442695, %v4277_v23 }
 0x7e7   :  { %v2365_v36 = vsel %vm2165_vm0, %v3108_v22, 0.0  ;;  %v4284_v28 = vsel %vm2165_vm0, %v2141_v44, -1e+30 }
 0x7e8   :  { %3109 = vpow2.f32 %v2310_v11  ;;  %2404 = vadd.xlane.f32.xlu0 %v2365_v36  ;;  %2244 = vmax.xlane.f32.xlu2 %v4284_v28 }
 0x7eb   :  { %v2217_v32 = vpop.xlane.xlu0 %2216 }
 0x7ec   :  { %v4288_v42 = vsub.f32 %v4159_v38, %v2217_v32  ;;  %v2143_v26 = vpop.f32.mrf.mxu1 }
 0x7ed   :  { %v2144_v16 = vadd.f32 %v2143_v26, %v2054_v25  ;;  %v2066_v25 = vpop.f32.mrf.mxu0 }
 0x7ee   :  { %v3110_v39 = vpop.eup %3109  ;;  %v2312_v5 = vmul.f32 1.442695, %v4288_v42 }
 0x7ef   :  { %v2366_v17 = vsel %vm2165_vm0, %v3110_v39, 0.0  ;;  %v4295_v13 = vsel %vm2165_vm0, %v2144_v16, -1e+30 }
 0x7f0   :  { %3111 = vpow2.f32 %v2312_v5  ;;  %2406 = vadd.xlane.f32.xlu1 %v2366_v17  ;;  %2246 = vmax.xlane.f32.xlu0 %v4295_v13 }
 0x7f3   :  { %v2219_v1 = vpop.xlane.xlu1 %2218 }
 0x7f4   :  { %v4299_v38 = vsub.f32 %v4165_v29, %v2219_v1  ;;  %v2145_v14 = vpop.f32.mrf.mxu1 }
 0x7f5   :  { %v2146_v45 = vadd.f32 %v2145_v14, %v2056_v27  ;;  %v2069_v27 = vpop.f32.mrf.mxu0 }
 0x7f6   :  { %v3112_v59 = vpop.eup %3111  ;;  %v2314_v51 = vmul.f32 1.442695, %v4299_v38 }
 0x7f7   :  { %v2367_v43 = vsel %vm2165_vm0, %v3112_v59, 0.0  ;;  %v4306_v60 = vsel %vm2165_vm0, %v2146_v45, -1e+30 }
 0x7f8   :  { %3113 = vpow2.f32 %v2314_v51  ;;  %2408 = vadd.xlane.f32.xlu2 %v2367_v43  ;;  %2248 = vmax.xlane.f32.xlu1 %v4306_v60 }
 0x7fb   :  { %v2221_v62 = vpop.xlane.xlu2 %2220 }
 0x7fc   :  { %v2148_v20 = vpop.f32.mrf.mxu1 }
 0x7fd   :  { %v2149_v29 = vadd.f32 %v2148_v20, %v2059_v54  ;;  %v2071_v43 = vpop.f32.mrf.mxu0 }
 0x7fe   :  { %v3114_v49 = vpop.eup %3113 }
 0x7ff   :  { %v2368_v30 = vsel %vm2165_vm0, %v3114_v49, 0.0  ;;  %v4313_v9 = vsel %vm2165_vm0, %v2149_v29, -1e+30 }
 0x800   :  { %2410 = vadd.xlane.f32.xlu0 %v2368_v30  ;;  %2250 = vmax.xlane.f32.xlu2 %v4313_v9 }
 0x803   :  { %v2223_v4 = vpop.xlane.xlu0 %2222 }
 0x804   :  { %v2150_v12 = vpop.f32.mrf.mxu1  ;;  %v4322_v3 = vsub.f32 %v4176_v18, %v2223_v4 }
 0x805   :  { %v2151_v34 = vadd.f32 %v2150_v12, %v2061_v31 }
 0x806   :  { %v2318_v8 = vmul.f32 1.442695, %v4322_v3 }
 0x807   :  { %v4318_v24 = vsel %vm2165_vm0, %v2151_v34, -1e+30 }
 0x808   :  { %2252 = vmax.xlane.f32.xlu0 %v4318_v24  ;;  %3115 = vpow2.f32 %v2318_v8 }
 0x80b   :  { %v2225_v40 = vpop.xlane.xlu1 %2224 }
 0x80c   :  { %v2153_v41 = vpop.f32.mrf.mxu1  ;;  %v4331_v11 = vsub.f32 %v4181_v56, %v2225_v40  ;;  %v4343_v56 = vsub.f32 %v4170_v37, %v2221_v62 }
 0x80d   :  { %v2154_v52 = vadd.f32 %v2153_v41, %v2064_v58 }
 0x80e   :  { %v2320_v36 = vmul.f32 1.442695, %v4331_v11  ;;  %v3116_v16 = vpop.eup %3115 }
 0x80f   :  { %v4326_v7 = vsel %vm2165_vm0, %v2154_v52, -1e+30  ;;  %v2370_v1 = vsel %vm2165_vm0, %v3116_v16, 0.0 }
 0x810   :  { %2254 = vmax.xlane.f32.xlu1 %v4326_v7  ;;  %3117 = vpow2.f32 %v2320_v36 }
 0x813   :  { %v2227_v32 = vpop.xlane.xlu2 %2226 }
 0x814   :  { %v2155_v44 = vpop.f32.mrf.mxu1  ;;  %v4359_v30 = vsub.f32 %v4187_v33, %v2227_v32 }
 0x815   :  { %v2156_v22 = vadd.f32 %v2155_v44, %v2066_v25 }
 0x816   :  { %v3118_v37 = vpop.eup %3117  ;;  %v2322_v4 = vmul.f32 1.442695, %v4359_v30 }
 0x817   :  { %v4335_v18 = vsel %vm2165_vm0, %v2156_v22, -1e+30  ;;  %v2371_v34 = vsel %vm2165_vm0, %v3118_v37, 0.0 }
 0x818   :  { %2256 = vmax.xlane.f32.xlu2 %v4335_v18 }
 0x81b   :  { %v2229_v26 = vpop.xlane.xlu0 %2228 }
 0x81c   :  { %v4340_v39 = vsub.f32 %v4196_v46, %v2229_v26  ;;  %v2158_v5 = vpop.f32.mrf.mxu1  ;;  %v2316_v46 = vmul.f32 1.442695, %v4343_v56 }
 0x81d   :  { %v2159_v17 = vadd.f32 %v2158_v5, %v2069_v27 }
 0x81e   :  { %v2324_v54 = vmul.f32 1.442695, %v4340_v39 }
 0x81f   :  { %v4350_v14 = vsel %vm2165_vm0, %v2159_v17, -1e+30 }
 0x820   :  { %3119 = vpow2.f32 %v2324_v54  ;;  %2414 = vadd.xlane.f32.xlu2 %v2370_v1  ;;  %2258 = vmax.xlane.f32.xlu0 %v4350_v14 }
 0x823   :  { %v2391_v45 = vpop.xlane.xlu2 %2390  ;;  %v2231_v59 = vpop.xlane.xlu1 %2230 }
 0x824   :  { %3121 = vlog2.f32 %v2391_v45  ;;  %v4355_v51 = vsub.f32 %v4207_v47, %v2231_v59  ;;  %v2160_v20 = vpop.f32.mrf.mxu1 }
 0x825   :  { %v2161_v31 = vadd.f32 %v2160_v20, %v2071_v43  ;;  %3123 = vpow2.f32 %v2316_v46 }
 0x826   :  { %v3120_v29 = vpop.eup %3119  ;;  %v2326_v49 = vmul.f32 1.442695, %v4355_v51 }
 0x827   :  { %v2373_v12 = vsel %vm2165_vm0, %v3120_v29, 0.0  ;;  %v4367_v47 = vsel %vm2165_vm0, %v2161_v31, -1e+30 }
 0x828   :  { %3125 = vpow2.f32 %v2326_v49  ;;  %2420 = vadd.xlane.f32.xlu2 %v2373_v12  ;;  %2416 = vadd.xlane.f32.xlu0 %v2371_v34 }
 0x829   :  { %2260 = vmax.xlane.f32.xlu1 %v4367_v47 }
 0x82a   :  { %v3122_v58 = vpop.eup %3121 }
 0x82b   :  { %v2455_v33 = vmul.f32 0.6931472, %v3122_v58  ;;  %v2393_v41 = vpop.xlane.xlu0 %2392  ;;  %v3124_v52 = vpop.eup %3123 }
 0x82c   :  { %3127 = vlog2.f32 %v2393_v41  ;;  %v2233_v25 = vpop.xlane.xlu2 %2232  ;;  %v2369_v22 = vsel %vm2165_vm0, %v3124_v52, 0.0 }
 0x82d   :  { %v2518_v8 = vsub.f32 %v4191_v35, %v2455_v33  ;;  %3129 = vpow2.f32 %v2322_v4  ;;  %v4378_v44 = vsub.f32 %v4218_v57, %v2233_v25 }
 0x82e   :  { %v3126_v62 = vpop.eup %3125 }
 0x82f   :  { %2550 = vst [vmem:[%s4602_s7] sm:$0xff] %v2518_v8  ;;  %v2374_v40 = vsel %vm2165_vm0, %v3126_v62, 0.0  ;;  %v2328_v32 = vmul.f32 1.442695, %v4378_v44 }
 0x830   :  { %2422 = vadd.xlane.f32.xlu0 %v2374_v40 }
 0x831   :  { %2412 = vadd.xlane.f32.xlu1 %v2369_v22 }
 0x832   :  { %v3128_v36 = vpop.eup %3127 }
 0x833   :  { %v2457_v27 = vmul.f32 0.6931472, %v3128_v36  ;;  %v2395_v35 = vpop.xlane.xlu1 %2394  ;;  %v2235_v26 = vpop.xlane.xlu0 %2234 }
 0x834   :  { %3131 = vlog2.f32 %v2395_v35  ;;  %v4384_v16 = vsub.f32 %v4229_v15, %v2235_v26  ;;  %v3130_v5 = vpop.eup %3129 }
 0x835   :  { %v2519_v17 = vsub.f32 %v4200_v50, %v2457_v27  ;;  %3133 = vpow2.f32 %v2328_v32  ;;  %v2372_v54 = vsel %vm2165_vm0, %v3130_v5, 0.0 }
 0x836   :  { %v2330_v57 = vmul.f32 1.442695, %v4384_v16 }
 0x837   :  { %2551 = vst [vmem:[%s4602_s7 + $0x8] sm:$0xff] %v2519_v17 }
 0x838   :  { %3135 = vpow2.f32 %v2330_v57 }
 0x839   :  { %2418 = vadd.xlane.f32.xlu1 %v2372_v54 }
 0x83a   :  { %v3132_v1 = vpop.eup %3131 }
 0x83b   :  { %v2459_v46 = vmul.f32 0.6931472, %v3132_v1  ;;  %v2397_v45 = vpop.xlane.xlu2 %2396  ;;  %v2237_v15 = vpop.xlane.xlu1 %2236 }
 0x83c   :  { %3137 = vlog2.f32 %v2397_v45  ;;  %v4394_v59 = vsub.f32 %v4240_v0, %v2237_v15  ;;  %v3134_v50 = vpop.eup %3133 }
 0x83d   :  { %v2520_v37 = vsub.f32 %v4211_v55, %v2459_v46  ;;  %v2375_v29 = vsel %vm2165_vm0, %v3134_v50, 0.0 }
 0x83e   :  { %v3136_v43 = vpop.eup %3135  ;;  %v2332_v20 = vmul.f32 1.442695, %v4394_v59 }
 0x83f   :  { %2552 = vst [vmem:[%s4602_s7 + $0x10] sm:$0xff] %v2520_v37  ;;  %v2376_v31 = vsel %vm2165_vm0, %v3136_v43, 0.0 }
 0x840   :  { %3139 = vpow2.f32 %v2332_v20  ;;  %2426 = vadd.xlane.f32.xlu2 %v2376_v31 }
 0x841   :  { %2424 = vadd.xlane.f32.xlu1 %v2375_v29 }
 0x842   :  { %v3138_v0 = vpop.eup %3137 }
 0x843   :  { %v2461_v49 = vmul.f32 0.6931472, %v3138_v0  ;;  %v2399_v12 = vpop.xlane.xlu0 %2398  ;;  %v2239_v55 = vpop.xlane.xlu2 %2238 }
 0x844   :  { %3141 = vlog2.f32 %v2399_v12  ;;  %v4406_v34 = vsub.f32 %v4251_v19, %v2239_v55 }
 0x845   :  { %v2521_v58 = vsub.f32 %v4222_v63, %v2461_v49 }
 0x846   :  { %v3140_v4 = vpop.eup %3139  ;;  %v2334_v33 = vmul.f32 1.442695, %v4406_v34 }
 0x847   :  { %2553 = vst [vmem:[%s4602_s7 + $0x18] sm:$0xff] %v2521_v58  ;;  %v2377_v41 = vsel %vm2165_vm0, %v3140_v4, 0.0 }
 0x848   :  { %3143 = vpow2.f32 %v2334_v33  ;;  %2428 = vadd.xlane.f32.xlu0 %v2377_v41 }
 0x84a   :  { %v3142_v52 = vpop.eup %3141 }
 0x84b   :  { %v2463_v25 = vmul.f32 0.6931472, %v3142_v52  ;;  %v2401_v8 = vpop.xlane.xlu1 %2400  ;;  %v2241_v62 = vpop.xlane.xlu0 %2240 }
 0x84c   :  { %3145 = vlog2.f32 %v2401_v8  ;;  %v4416_v19 = vsub.f32 %v4262_v2, %v2241_v62 }
 0x84d   :  { %v2522_v63 = vsub.f32 %v4233_v6, %v2463_v25 }
 0x84e   :  { %v3144_v40 = vpop.eup %3143  ;;  %v2336_v22 = vmul.f32 1.442695, %v4416_v19 }
 0x84f   :  { %2554 = vst [vmem:[%s4602_s7 + $0x20] sm:$0xff] %v2522_v63  ;;  %v2378_v36 = vsel %vm2165_vm0, %v3144_v40, 0.0 }
 0x850   :  { %3147 = vpow2.f32 %v2336_v22  ;;  %2430 = vadd.xlane.f32.xlu1 %v2378_v36 }
 0x852   :  { %v3146_v27 = vpop.eup %3145 }
 0x853   :  { %v2465_v35 = vmul.f32 0.6931472, %v3146_v27  ;;  %v2403_v32 = vpop.xlane.xlu2 %2402  ;;  %v2243_v26 = vpop.xlane.xlu1 %2242 }
 0x854   :  { %3149 = vlog2.f32 %v2403_v32  ;;  %v4426_v2 = vsub.f32 %v4273_v48, %v2243_v26 }
 0x855   :  { %v2523_v6 = vsub.f32 %v4244_v53, %v2465_v35 }
 0x856   :  { %v3148_v5 = vpop.eup %3147  ;;  %v2338_v17 = vmul.f32 1.442695, %v4426_v2 }
 0x857   :  { %2555 = vst [vmem:[%s4602_s7 + $0x28] sm:$0xff] %v2523_v6  ;;  %v2379_v57 = vsel %vm2165_vm0, %v3148_v5, 0.0 }
 0x858   :  { %3151 = vpow2.f32 %v2338_v17  ;;  %2432 = vadd.xlane.f32.xlu2 %v2379_v57 }
 0x85a   :  { %v3150_v54 = vpop.eup %3149 }
 0x85b   :  { %v2467_v1 = vmul.f32 0.6931472, %v3150_v54  ;;  %v2405_v46 = vpop.xlane.xlu0 %2404  ;;  %v2245_v45 = vpop.xlane.xlu2 %2244 }
 0x85c   :  { %3153 = vlog2.f32 %v2405_v46  ;;  %v4436_v48 = vsub.f32 %v4284_v28, %v2245_v45 }
 0x85d   :  { %v2524_v53 = vsub.f32 %v4255_v61, %v2467_v1 }
 0x85e   :  { %v3152_v15 = vpop.eup %3151  ;;  %v2340_v50 = vmul.f32 1.442695, %v4436_v48 }
 0x85f   :  { %2556 = vst [vmem:[%s4602_s7 + $0x30] sm:$0xff] %v2524_v53  ;;  %v2380_v37 = vsel %vm2165_vm0, %v3152_v15, 0.0 }
 0x860   :  { %3155 = vpow2.f32 %v2340_v50  ;;  %2434 = vadd.xlane.f32.xlu0 %v2380_v37 }
 0x862   :  { %v3154_v43 = vpop.eup %3153 }
 0x863   :  { %v2469_v20 = vmul.f32 0.6931472, %v3154_v43  ;;  %v2407_v31 = vpop.xlane.xlu1 %2406  ;;  %v2247_v29 = vpop.xlane.xlu0 %2246 }
 0x864   :  { %3157 = vlog2.f32 %v2407_v31  ;;  %v4446_v28 = vsub.f32 %v4295_v13, %v2247_v29 }
 0x865   :  { %v2525_v61 = vsub.f32 %v4266_v10, %v2469_v20 }
 0x866   :  { %v3156_v0 = vpop.eup %3155  ;;  %v2342_v49 = vmul.f32 1.442695, %v4446_v28 }
 0x867   :  { %2557 = vst [vmem:[%s4602_s7 + $0x38] sm:$0xff] %v2525_v61  ;;  %v2381_v12 = vsel %vm2165_vm0, %v3156_v0, 0.0 }
 0x868   :  { %3159 = vpow2.f32 %v2342_v49  ;;  %2436 = vadd.xlane.f32.xlu1 %v2381_v12 }
 0x86a   :  { %v3158_v55 = vpop.eup %3157 }
 0x86b   :  { %v2471_v58 = vmul.f32 0.6931472, %v3158_v55  ;;  %v2409_v4 = vpop.xlane.xlu2 %2408  ;;  %v2249_v33 = vpop.xlane.xlu1 %2248 }
 0x86c   :  { %3161 = vlog2.f32 %v2409_v4  ;;  %v4456_v13 = vsub.f32 %v4306_v60, %v2249_v33 }
 0x86d   :  { %v2526_v10 = vsub.f32 %v4277_v23, %v2471_v58 }
 0x86e   :  { %v3160_v41 = vpop.eup %3159  ;;  %v2344_v52 = vmul.f32 1.442695, %v4456_v13 }
 0x86f   :  { %2558 = vst [vmem:[%s4602_s7 + $0x40] sm:$0xff] %v2526_v10  ;;  %v2382_v25 = vsel %vm2165_vm0, %v3160_v41, 0.0 }
 0x870   :  { %3163 = vpow2.f32 %v2344_v52  ;;  %2438 = vadd.xlane.f32.xlu2 %v2382_v25 }
 0x872   :  { %v3162_v8 = vpop.eup %3161 }
 0x873   :  { %v2473_v62 = vmul.f32 0.6931472, %v3162_v8  ;;  %v2411_v63 = vpop.xlane.xlu0 %2410  ;;  %v2251_v40 = vpop.xlane.xlu2 %2250 }
 0x874   :  { %3165 = vlog2.f32 %v2411_v63  ;;  %v4466_v60 = vsub.f32 %v4313_v9, %v2251_v40 }
 0x875   :  { %v2527_v23 = vsub.f32 %v4288_v42, %v2473_v62 }
 0x876   :  { %v3164_v22 = vpop.eup %3163  ;;  %v2346_v36 = vmul.f32 1.442695, %v4466_v60 }
 0x877   :  { %2559 = vst [vmem:[%s4602_s7 + $0x48] sm:$0xff] %v2527_v23  ;;  %v2383_v27 = vsel %vm2165_vm0, %v3164_v22, 0.0 }
 0x878   :  { %3167 = vpow2.f32 %v2346_v36  ;;  %2440 = vadd.xlane.f32.xlu0 %v2383_v27 }
 0x87a   :  { %v3166_v35 = vpop.eup %3165 }
 0x87b   :  { %v2475_v32 = vmul.f32 0.6931472, %v3166_v35  ;;  %v2253_v26 = vpop.xlane.xlu0 %2252 }
 0x87c   :  { %v4476_v9 = vsub.f32 %v4318_v24, %v2253_v26 }
 0x87d   :  { %v2528_v42 = vsub.f32 %v4299_v38, %v2475_v32 }
 0x87e   :  { %v3168_v6 = vpop.eup %3167  ;;  %v2348_v5 = vmul.f32 1.442695, %v4476_v9 }
 0x87f   :  { %2560 = vst [vmem:[%s4602_s7 + $0x50] sm:$0xff] %v2528_v42  ;;  %v2384_v17 = vsel %vm2165_vm0, %v3168_v6, 0.0 }
 0x880   :  { %3169 = vpow2.f32 %v2348_v5  ;;  %2442 = vadd.xlane.f32.xlu1 %v2384_v17 }
 0x883   :  { %v2255_v57 = vpop.xlane.xlu1 %2254 }
 0x884   :  { %v4486_v54 = vsub.f32 %v4326_v7, %v2255_v57 }
 0x886   :  { %v3170_v24 = vpop.eup %3169  ;;  %v2350_v1 = vmul.f32 1.442695, %v4486_v54 }
 0x887   :  { %v2385_v38 = vsel %vm2165_vm0, %v3170_v24, 0.0 }
 0x888   :  { %3171 = vpow2.f32 %v2350_v1  ;;  %2444 = vadd.xlane.f32.xlu2 %v2385_v38 }
 0x88b   :  { %v2257_v46 = vpop.xlane.xlu2 %2256 }
 0x88c   :  { %v4492_v45 = vsub.f32 %v4335_v18, %v2257_v46 }
 0x88e   :  { %v3172_v53 = vpop.eup %3171  ;;  %v2352_v15 = vmul.f32 1.442695, %v4492_v45 }
 0x88f   :  { %v2386_v50 = vsel %vm2165_vm0, %v3172_v53, 0.0 }
 0x890   :  { %3173 = vpow2.f32 %v2352_v15  ;;  %2446 = vadd.xlane.f32.xlu0 %v2386_v50 }
 0x893   :  { %v2415_v7 = vpop.xlane.xlu2 %2414  ;;  %v2259_v37 = vpop.xlane.xlu0 %2258 }
 0x894   :  { %3175 = vlog2.f32 %v2415_v7  ;;  %v4498_v43 = vsub.f32 %v4350_v14, %v2259_v37 }
 0x896   :  { %v3174_v20 = vpop.eup %3173  ;;  %v2354_v31 = vmul.f32 1.442695, %v4498_v43 }
 0x897   :  { %v2387_v18 = vsel %vm2165_vm0, %v3174_v20, 0.0 }
 0x898   :  { %3177 = vpow2.f32 %v2354_v31  ;;  %2448 = vadd.xlane.f32.xlu1 %v2387_v18 }
 0x89a   :  { %v3176_v29 = vpop.eup %3175 }
 0x89b   :  { %v2479_v61 = vmul.f32 0.6931472, %v3176_v29  ;;  %v2421_v0 = vpop.xlane.xlu2 %2420  ;;  %v2417_v49 = vpop.xlane.xlu0 %2416 }
 0x89c   :  { %3179 = vlog2.f32 %v2421_v0  ;;  %v2261_v12 = vpop.xlane.xlu1 %2260 }
 0x89d   :  { %v2530_v55 = vsub.f32 %v4322_v3, %v2479_v61  ;;  %3181 = vlog2.f32 %v2417_v49  ;;  %v4505_v14 = vsub.f32 %v4367_v47, %v2261_v12 }
 0x89e   :  { %v3178_v58 = vpop.eup %3177 }
 0x89f   :  { %2562 = vst [vmem:[%s4602_s7 + $0x60] sm:$0xff] %v2530_v55  ;;  %v2356_v4 = vmul.f32 1.442695, %v4505_v14  ;;  %v2388_v33 = vsel %vm2165_vm0, %v3178_v58, 0.0 }
 0x8a0   :  { %2450 = vadd.xlane.f32.xlu2 %v2388_v33 }
 0x8a1   :  { %3183 = vpow2.f32 %v2356_v4 }
 0x8a2   :  { %v3180_v10 = vpop.eup %3179 }
 0x8a3   :  { %v3182_v41 = vpop.eup %3181  ;;  %v2485_v52 = vmul.f32 0.6931472, %v3180_v10  ;;  %v2423_v3 = vpop.xlane.xlu0 %2422 }
 0x8a4   :  { %v2481_v25 = vmul.f32 0.6931472, %v3182_v41  ;;  %3185 = vlog2.f32 %v2423_v3  ;;  %v2413_v47 = vpop.xlane.xlu1 %2412 }
 0x8a5   :  { %v2533_v8 = vsub.f32 %v4340_v39, %v2485_v52  ;;  %3187 = vlog2.f32 %v2413_v47 }
 0x8a6   :  { %v2531_v62 = vsub.f32 %v4331_v11, %v2481_v25 }
 0x8a7   :  { %v3184_v63 = vpop.eup %3183  ;;  %2565 = vst [vmem:[%s4602_s7 + $0x78] sm:$0xff] %v2533_v8 }
 0x8a8   :  { %2563 = vst [vmem:[%s4602_s7 + $0x68] sm:$0xff] %v2531_v62  ;;  %v2389_v40 = vsel %vm2165_vm0, %v3184_v63, 0.0 }
 0x8a9   :  { %2452 = vadd.xlane.f32.xlu0 %v2389_v40 }
 0x8aa   :  { %v3186_v23 = vpop.eup %3185 }
 0x8ab   :  { %v3188_v22 = vpop.eup %3187  ;;  %v2487_v36 = vmul.f32 0.6931472, %v3186_v23 }
 0x8ac   :  { %v2477_v39 = vmul.f32 0.6931472, %v3188_v22  ;;  %v2419_v27 = vpop.xlane.xlu1 %2418 }
 0x8ad   :  { %v2534_v11 = vsub.f32 %v4355_v51, %v2487_v36  ;;  %3189 = vlog2.f32 %v2419_v27 }
 0x8ae   :  { %v2529_v35 = vsub.f32 %v4343_v56, %v2477_v39 }
 0x8af   :  { %2566 = vst [vmem:[%s4602_s7 + $0x80] sm:$0xff] %v2534_v11 }
 0x8b0   :  { %2561 = vst [vmem:[%s4602_s7 + $0x58] sm:$0xff] %v2529_v35 }
 0x8b3   :  { %v3190_v21 = vpop.eup %3189  ;;  %v2427_v32 = vpop.xlane.xlu2 %2426 }
 0x8b4   :  { %v2483_v26 = vmul.f32 0.6931472, %v3190_v21  ;;  %3191 = vlog2.f32 %v2427_v32  ;;  %v2425_v42 = vpop.xlane.xlu1 %2424 }
 0x8b5   :  { %3193 = vlog2.f32 %v2425_v42 }
 0x8b6   :  { %v2532_v6 = vsub.f32 %v4359_v30, %v2483_v26 }
 0x8b8   :  { %2564 = vst [vmem:[%s4602_s7 + $0x70] sm:$0xff] %v2532_v6 }
 0x8ba   :  { %v3192_v56 = vpop.eup %3191 }
 0x8bb   :  { %v3194_v51 = vpop.eup %3193  ;;  %v2491_v5 = vmul.f32 0.6931472, %v3192_v56  ;;  %v2429_v17 = vpop.xlane.xlu0 %2428 }
 0x8bc   :  { %v2489_v57 = vmul.f32 0.6931472, %v3194_v51  ;;  %3195 = vlog2.f32 %v2429_v17 }
 0x8bd   :  { %v2536_v24 = vsub.f32 %v4384_v16, %v2491_v5 }
 0x8be   :  { %v2535_v1 = vsub.f32 %v4378_v44, %v2489_v57 }
 0x8bf   :  { %2568 = vst [vmem:[%s4602_s7 + $0x90] sm:$0xff] %v2536_v24 }
 0x8c0   :  { %2567 = vst [vmem:[%s4602_s7 + $0x88] sm:$0xff] %v2535_v1 }
 0x8c2   :  { %v3196_v30 = vpop.eup %3195 }
 0x8c3   :  { %v2493_v38 = vmul.f32 0.6931472, %v3196_v30  ;;  %v2431_v46 = vpop.xlane.xlu1 %2430 }
 0x8c4   :  { %3197 = vlog2.f32 %v2431_v46 }
 0x8c5   :  { %v2537_v53 = vsub.f32 %v4394_v59, %v2493_v38 }
 0x8c7   :  { %2569 = vst [vmem:[%s4602_s7 + $0x98] sm:$0xff] %v2537_v53 }
 0x8ca   :  { %v3198_v16 = vpop.eup %3197 }
 0x8cb   :  { %v2495_v44 = vmul.f32 0.6931472, %v3198_v16  ;;  %v2433_v15 = vpop.xlane.xlu2 %2432 }
 0x8cc   :  { %3199 = vlog2.f32 %v2433_v15 }
 0x8cd   :  { %v2538_v50 = vsub.f32 %v4406_v34, %v2495_v44 }
 0x8cf   :  { %2570 = vst [vmem:[%s4602_s7 + $0xa0] sm:$0xff] %v2538_v50 }
 0x8d2   :  { %v3200_v7 = vpop.eup %3199 }
 0x8d3   :  { %v2497_v37 = vmul.f32 0.6931472, %v3200_v7  ;;  %v2435_v20 = vpop.xlane.xlu0 %2434 }
 0x8d4   :  { %3201 = vlog2.f32 %v2435_v20 }
 0x8d5   :  { %v2539_v59 = vsub.f32 %v4416_v19, %v2497_v37 }
 0x8d7   :  { %2571 = vst [vmem:[%s4602_s7 + $0xa8] sm:$0xff] %v2539_v59 }
 0x8da   :  { %v3202_v31 = vpop.eup %3201 }
 0x8db   :  { %v2499_v18 = vmul.f32 0.6931472, %v3202_v31  ;;  %v2437_v29 = vpop.xlane.xlu1 %2436 }
 0x8dc   :  { %3203 = vlog2.f32 %v2437_v29 }
 0x8dd   :  { %v2540_v34 = vsub.f32 %v4426_v2, %v2499_v18 }
 0x8df   :  { %2572 = vst [vmem:[%s4602_s7 + $0xb0] sm:$0xff] %v2540_v34 }
 0x8e2   :  { %v3204_v61 = vpop.eup %3203 }
 0x8e3   :  { %v2501_v0 = vmul.f32 0.6931472, %v3204_v61  ;;  %v2439_v49 = vpop.xlane.xlu2 %2438 }
 0x8e4   :  { %3205 = vlog2.f32 %v2439_v49 }
 0x8e5   :  { %v2541_v19 = vsub.f32 %v4436_v48, %v2501_v0 }
 0x8e7   :  { %2573 = vst [vmem:[%s4602_s7 + $0xb8] sm:$0xff] %v2541_v19 }
 0x8ea   :  { %v3206_v12 = vpop.eup %3205 }
 0x8eb   :  { %v2503_v55 = vmul.f32 0.6931472, %v3206_v12  ;;  %v2441_v58 = vpop.xlane.xlu0 %2440 }
 0x8ec   :  { %3207 = vlog2.f32 %v2441_v58 }
 0x8ed   :  { %v2542_v2 = vsub.f32 %v4446_v28, %v2503_v55 }
 0x8ef   :  { %2574 = vst [vmem:[%s4602_s7 + $0xc0] sm:$0xff] %v2542_v2 }
 0x8f2   :  { %v3208_v4 = vpop.eup %3207 }
 0x8f3   :  { %v2505_v33 = vmul.f32 0.6931472, %v3208_v4  ;;  %v2443_v10 = vpop.xlane.xlu1 %2442 }
 0x8f4   :  { %3209 = vlog2.f32 %v2443_v10 }
 0x8f5   :  { %v2543_v48 = vsub.f32 %v4456_v13, %v2505_v33 }
 0x8f7   :  { %2575 = vst [vmem:[%s4602_s7 + $0xc8] sm:$0xff] %v2543_v48 }
 0x8fa   :  { %v3210_v41 = vpop.eup %3209 }
 0x8fb   :  { %v2507_v52 = vmul.f32 0.6931472, %v3210_v41  ;;  %v2445_v3 = vpop.xlane.xlu2 %2444 }
 0x8fc   :  { %3211 = vlog2.f32 %v2445_v3 }
 0x8fd   :  { %v2544_v28 = vsub.f32 %v4466_v60, %v2507_v52 }
 0x8ff   :  { %2576 = vst [vmem:[%s4602_s7 + $0xd0] sm:$0xff] %v2544_v28 }
 0x902   :  { %v3212_v25 = vpop.eup %3211 }
 0x903   :  { %v2509_v47 = vmul.f32 0.6931472, %v3212_v25  ;;  %v2447_v8 = vpop.xlane.xlu0 %2446 }
 0x904   :  { %3213 = vlog2.f32 %v2447_v8 }
 0x905   :  { %v2545_v13 = vsub.f32 %v4476_v9, %v2509_v47 }
 0x907   :  { %2577 = vst [vmem:[%s4602_s7 + $0xd8] sm:$0xff] %v2545_v13 }
 0x90a   :  { %v3214_v62 = vpop.eup %3213 }
 0x90b   :  { %v2511_v63 = vmul.f32 0.6931472, %v3214_v62  ;;  %v2449_v40 = vpop.xlane.xlu1 %2448 }
 0x90c   :  { %3215 = vlog2.f32 %v2449_v40 }
 0x90d   :  { %v2546_v60 = vsub.f32 %v4486_v54, %v2511_v63 }
 0x90f   :  { %2578 = vst [vmem:[%s4602_s7 + $0xe0] sm:$0xff] %v2546_v60 }
 0x912   :  { %v3216_v23 = vpop.eup %3215 }
 0x913   :  { %v2513_v22 = vmul.f32 0.6931472, %v3216_v23  ;;  %v2451_v36 = vpop.xlane.xlu2 %2450 }
 0x914   :  { %3217 = vlog2.f32 %v2451_v36 }
 0x915   :  { %v2547_v9 = vsub.f32 %v4492_v45, %v2513_v22 }
 0x917   :  { %2579 = vst [vmem:[%s4602_s7 + $0xe8] sm:$0xff] %v2547_v9 }
 0x91a   :  { %v3218_v39 = vpop.eup %3217 }
 0x91b   :  { %v2515_v27 = vmul.f32 0.6931472, %v3218_v39 }
 0x91c   :  { %v2453_v11 = vpop.xlane.xlu0 %2452 }
 0x91d   :  { %v2548_v35 = vsub.f32 %v4498_v43, %v2515_v27  ;;  %3219 = vlog2.f32 %v2453_v11 }
 0x91f   :  { %2580 = vst [vmem:[%s4602_s7 + $0xf0] sm:$0xff] %v2548_v35 }
 0x923   :  { %v3220_v54 = vpop.eup %3219 }
 0x924   :  { %v2517_v21 = vmul.f32 0.6931472, %v3220_v54 }
 0x926   :  { %v2549_v32 = vsub.f32 %v4505_v14, %v2517_v21 }
 0x928   :  { %2581 = vst [vmem:[%s4602_s7 + $0xf8] sm:$0xff] %v2549_v32 }
 0x929   :  { %2586 = vsyncpa [#allocation3], 1 }
 0x92a   :  { %2587 = vsyncpa [#allocation5], 1 }

</bundles_post_ra>
